<compile_context>
chip_gen: v5e
topology: v5e:2x2
jax: 0.10.0
libtpu: 0.0.40
codegen_flags: <defaults>
</compile_context>

<pallas_src>
import functools

import jax
import jax.numpy as jnp
from jax.experimental import pallas as pl
from jax.experimental.pallas import tpu as pltpu


def _round_up(x, m):
    return ((x + m - 1) // m) * m


def _choose_cout_tile(cout_p, m2, budget_bytes=6 << 20):
    """Largest multiple-of-128 divisor of cout_p whose f32 (m2, tile) block fits budget."""
    best = 128
    t = 128
    while t <= cout_p:
        if cout_p % t == 0 and m2 * t * 4 <= budget_bytes:
            best = t
        t += 128
    return best


# ---------------- Pallas kernels ----------------

def _conv_stats_kernel(x_ref, w_ref, mask_ref, y_ref, s1_ref, s2_ref, *,
                       m_rows, wp, kh_sz, kw_sz, cout_t):
    """Direct conv for one image (one Cout tile) + per-channel sum / sum-of-squares.

    x_ref    : (LP, Cin)              bf16  zero-padded, spatially-flattened image
    w_ref    : (KH*KW, Cin, cout_t)   bf16
    mask_ref : (M2, 1)                f32   1.0 on rows that are real output positions
    y_ref    : (M2, cout_t)           f32   stride-1 conv output (flat, incl. junk cols)
    s1_ref   : (8, cout_t)            f32   masked channel sum (broadcast over sublanes)
    s2_ref   : (8, cout_t)            f32   masked channel sum of squares
    """
    acc = jnp.zeros((m_rows, cout_t), jnp.float32)
    for kh in range(kh_sz):
        for kw in range(kw_sz):
            off = kh * wp + kw                                 # static shift
            patch = x_ref[off:off + m_rows, :]                 # (M2, Cin) bf16 view
            acc = acc + jnp.dot(patch, w_ref[kh * kw_sz + kw],
                                preferred_element_type=jnp.float32)
    y_ref[...] = acc
    msk = mask_ref[...]                                        # (M2, 1)
    am = acc * msk
    s1 = jnp.sum(am, axis=0, keepdims=True)                    # (1, cout_t)
    s2 = jnp.sum(am * acc, axis=0, keepdims=True)
    s1_ref[...] = jnp.broadcast_to(s1, (8, cout_t))
    s2_ref[...] = jnp.broadcast_to(s2, (8, cout_t))


def _bn_relu_kernel(y_ref, scale_ref, shift_ref, o_ref):
    # y_ref: (TR, Cout_p) f32; scale/shift: (1, Cout_p) f32 broadcast over rows.
    o_ref[...] = jnp.maximum(y_ref[...] * scale_ref[...] + shift_ref[...], 0.0)


# ---------------- Wrapper ----------------

def conv_bn_relu(x_nchw, weight, bias, gamma, beta, *, stride, padding, eps=1e-5,
                 bn_tile_rows=1024):
    """Forward of the PyTorch `Conv` module (Conv2d -> BatchNorm2d(train) -> ReLU).

    x_nchw : (N, Cin, H, W);  weight : (Cout, Cin, KH, KW);  bias/gamma/beta : (Cout,)
    Returns (N, Cout, OH, OW) float32.
    """
    del bias  # exactly cancelled by the batch-mean subtraction of training-mode BN
    N, Cin, H, W = x_nchw.shape
    Cout, _, KH, KW = weight.shape
    HP, WP = H + 2 * padding, W + 2 * padding
    OH = (H + 2 * padding - KH) // stride + 1
    OW = (W + 2 * padding - KW) // stride + 1
    OHf = HP - KH + 1                       # stride-1 output height
    M2 = OHf * WP                           # flat conv rows per image (incl. junk cols)
    LP = _round_up(HP * WP + KW - 1, 8)     # flat input rows (covers largest shift)
    Cout_p = _round_up(Cout, 128)           # lane-dense output channels
    TCO = _choose_cout_tile(Cout_p, M2)     # per-grid-step Cout tile (VMEM-aware)

    # ---- glue (plain JAX): pad + flatten input, repack weights; NO im2col ----
    x_nhwc = jnp.transpose(x_nchw, (0, 2, 3, 1))
    xp = jnp.pad(x_nhwc, ((0, 0), (padding, padding), (padding, padding), (0, 0)))
    xflat = xp.reshape(N, HP * WP, Cin)
    xflat = jnp.pad(xflat, ((0, 0), (0, LP - HP * WP), (0, 0))).astype(jnp.bfloat16)

    w = jnp.transpose(weight, (2, 3, 1, 0)).reshape(KH * KW, Cin, Cout)
    w = jnp.pad(w, ((0, 0), (0, 0), (0, Cout_p - Cout))).astype(jnp.bfloat16)

    # validity mask for the flat rows (drops wrap-around columns; applies stride)
    ii = jnp.arange(M2)
    rf, cf = ii // WP, ii % WP
    valid = cf <= (WP - KW)
    if stride > 1:
        valid = valid & (rf % stride == 0) & (cf % stride == 0)
    mask = valid.astype(jnp.float32).reshape(M2, 1)

    # ---- hot path 1: direct conv + BN partial sums (Pallas, grid over batch x Cout) ----
    # Inner grid axis is the Cout tile: the image block index is unchanged across it,
    # so Pallas does not re-DMA the flattened input between Cout tiles.
    # TODO(synk): for large images, tile the flattened spatial axis (overlapping row
    # slabs via manual DMA double-buffering) instead of one whole image per grid step.
    conv_kernel = functools.partial(_conv_stats_kernel, m_rows=M2, wp=WP,
                                    kh_sz=KH, kw_sz=KW, cout_t=TCO)
    n_ct = Cout_p // TCO
    y, s1, s2 = pl.pallas_call(
        conv_kernel,
        out_shape=(jax.ShapeDtypeStruct((N, M2, Cout_p), jnp.float32),
                   jax.ShapeDtypeStruct((N, 8, Cout_p), jnp.float32),
                   jax.ShapeDtypeStruct((N, 8, Cout_p), jnp.float32)),
        grid=(N, n_ct),
        in_specs=[
            pl.BlockSpec((None, LP, Cin), lambda n, j: (n, 0, 0)),
            pl.BlockSpec((KH * KW, Cin, TCO), lambda n, j: (0, 0, j)),
            pl.BlockSpec((M2, 1), lambda n, j: (0, 0)),
        ],
        out_specs=(
            pl.BlockSpec((None, M2, TCO), lambda n, j: (n, 0, j)),
            pl.BlockSpec((None, 8, TCO), lambda n, j: (n, 0, j)),
            pl.BlockSpec((None, 8, TCO), lambda n, j: (n, 0, j)),
        ),
        compiler_params=pltpu.CompilerParams(
            dimension_semantics=("parallel", "parallel")),
    )(xflat, w, mask)

    # ---- tiny JAX reduction: batch-stat BN scale/shift (biased variance) ----
    count = jnp.float32(N * OH * OW)
    tot1 = jnp.sum(s1[:, 0, :], axis=0)                       # (Cout_p,)
    tot2 = jnp.sum(s2[:, 0, :], axis=0)
    mean = tot1 / count
    var = jnp.maximum(tot2 / count - mean * mean, 0.0)
    inv_std = jax.lax.rsqrt(var + eps)
    gamma_p = jnp.pad(gamma.astype(jnp.float32), (0, Cout_p - Cout), constant_values=1.0)
    beta_p = jnp.pad(beta.astype(jnp.float32), (0, Cout_p - Cout))
    scale = (gamma_p * inv_std).reshape(1, Cout_p)
    shift = (beta_p - mean * gamma_p * inv_std).reshape(1, Cout_p)

    # ---- hot path 2: fused BN-affine + ReLU over lane-dense row tiles (Pallas) ----
    M_total = N * M2
    y2d = y.reshape(M_total, Cout_p)
    tile = bn_tile_rows
    if M_total <= tile:
        tile = max(8, _round_up(pl.cdiv(M_total, 2), 8))      # >=2 tiles -> both v7x TCs
    M_pad = _round_up(M_total, tile)
    if M_pad != M_total:
        y2d = jnp.pad(y2d, ((0, M_pad - M_total), (0, 0)))
    out2d = pl.pallas_call(
        _bn_relu_kernel,
        out_shape=jax.ShapeDtypeStruct((M_pad, Cout_p), jnp.float32),
        grid=(M_pad // tile,),
        in_specs=[
            pl.BlockSpec((tile, Cout_p), lambda i: (i, 0)),
            pl.BlockSpec((1, Cout_p), lambda i: (0, 0)),
            pl.BlockSpec((1, Cout_p), lambda i: (0, 0)),
        ],
        out_specs=pl.BlockSpec((tile, Cout_p), lambda i: (i, 0)),
        compiler_params=pltpu.CompilerParams(dimension_semantics=("parallel",)),
    )(y2d, scale, shift)

    # ---- unflatten: drop junk columns, apply stride, crop channels, back to NCHW ----
    out = out2d[:M_total].reshape(N, OHf, WP, Cout_p)
    out = out[:, ::stride, ::stride, :][:, :OH, :OW, :Cout]
    return jnp.transpose(out, (0, 3, 1, 2))


# ---------------- Demo / smoke test ----------------

if __name__ == "__main__":

    def run_case(stride, padding, key):
        # Module config: Conv(in_channels=4, out_channels=8, kernel_size=3, stride, padding)
        N, Cin, H, W = 2, 4, 16, 16
        Cout, KH, KW = 8, 3, 3

        kx, kw_, kb, kg, kbeta = jax.random.split(key, 5)
        x = jax.random.normal(kx, (N, Cin, H, W), dtype=jnp.float32)
        weight = 0.1 * jax.random.normal(kw_, (Cout, Cin, KH, KW), dtype=jnp.float32)
        bias = 0.1 * jax.random.normal(kb, (Cout,), dtype=jnp.float32)
        gamma = jnp.ones((Cout,), jnp.float32) + 0.05 * jax.random.normal(kg, (Cout,))
        beta = 0.05 * jax.random.normal(kbeta, (Cout,), dtype=jnp.float32)

        y = conv_bn_relu(x, weight, bias, gamma, beta, stride=stride, padding=padding)
        y = jax.block_until_ready(y)

        OH = (H + 2 * padding - KH) // stride + 1
        OW = (W + 2 * padding - KW) // stride + 1
        assert y.shape == (N, Cout, OH, OW), y.shape
        assert bool(jnp.all(y >= 0.0))

        def bn_relu_ref(z):
            m = jnp.mean(z, axis=(0, 2, 3), keepdims=True)
            v = jnp.mean((z - m) ** 2, axis=(0, 2, 3), keepdims=True)
            z = (z - m) * jax.lax.rsqrt(v + 1e-5)
            z = z * gamma.reshape(1, Cout, 1, 1) + beta.reshape(1, Cout, 1, 1)
            return jnp.maximum(z, 0.0)

        # strict check: reference with the same bf16 matmul-operand precision as the kernel
        conv_bf16 = jax.lax.conv_general_dilated(
            x.astype(jnp.bfloat16), weight.astype(jnp.bfloat16),
            window_strides=(stride, stride),
            padding=((padding, padding), (padding, padding)),
            dimension_numbers=("NCHW", "OIHW", "NCHW"),
            preferred_element_type=jnp.float32,
        ) + bias.reshape(1, Cout, 1, 1)
        assert bool(jnp.allclose(y, bn_relu_ref(conv_bf16), atol=2e-3, rtol=2e-3)), \
            f"strict mismatch (stride={stride})"

        # loose check vs full-f32 module semantics (bf16 matmul operands loosen tolerance)
        conv_f32 = jax.lax.conv_general_dilated(
            x, weight, window_strides=(stride, stride),
            padding=((padding, padding), (padding, padding)),
            dimension_numbers=("NCHW", "OIHW", "NCHW"),
        ) + bias.reshape(1, Cout, 1, 1)
        assert bool(jnp.allclose(y, bn_relu_ref(conv_f32), atol=5e-2, rtol=5e-2)), \
            f"loose mismatch (stride={stride})"

    key = jax.random.PRNGKey(0)
    k1, k2 = jax.random.split(key)
    run_case(stride=1, padding=1, key=k1)
    run_case(stride=2, padding=1, key=k2)
    print("KERNEL_OK")
</pallas_src>

<mosaic_0001>
module attributes {stable_mosaic.version = 11 : i64} {
  func.func @_conv_stats_kernel(%arg0: i32, %arg1: i32, %arg2: memref<1x328x4xbf16, #tpu.memory_space<vmem>>, %arg3: memref<9x4x128xbf16, #tpu.memory_space<vmem>>, %arg4: memref<288x1xf32, #tpu.memory_space<vmem>>, %arg5: memref<1x288x128xf32, #tpu.memory_space<vmem>>, %arg6: memref<1x8x128xf32, #tpu.memory_space<vmem>>, %arg7: memref<1x8x128xf32, #tpu.memory_space<vmem>>) attributes {dimension_semantics = [#tpu.dimension_semantics<parallel>, #tpu.dimension_semantics<parallel>], iteration_bounds = array<i64: 2, 1>, scalar_prefetch = 0 : i64, scratch_operands = 0 : i64, tpu.core_type = #tpu.core_type<tc>, window_params = [{transform_indices = @transform_0, window_bounds = array<i64: 1, 328, 4>}, {transform_indices = @transform_1, window_bounds = array<i64: 9, 4, 128>}, {pipeline_mode = #tpu.pipeline_mode<synchronous>, transform_indices = @transform_2, window_bounds = array<i64: 288, 1>}, {transform_indices = @transform_3, window_bounds = array<i64: 1, 288, 128>}, {transform_indices = @transform_4, window_bounds = array<i64: 1, 8, 128>}, {transform_indices = @transform_5, window_bounds = array<i64: 1, 8, 128>}]} {
    %cst = arith.constant 0.000000e+00 : f32
    %0 = vector.broadcast %cst : f32 to vector<288x128xf32>
    %c0 = arith.constant 0 : index
    %c0_0 = arith.constant 0 : index
    %c0_1 = arith.constant 0 : index
    %1 = vector.load %arg2[%c0, %c0_0, %c0_1] : memref<1x328x4xbf16, #tpu.memory_space<vmem>>, vector<1x288x4xbf16>
    %2 = vector.shape_cast %1 : vector<1x288x4xbf16> to vector<288x4xbf16>
    %c0_2 = arith.constant 0 : index
    %c0_3 = arith.constant 0 : index
    %c0_4 = arith.constant 0 : index
    %3 = vector.load %arg3[%c0_2, %c0_3, %c0_4] : memref<9x4x128xbf16, #tpu.memory_space<vmem>>, vector<1x4x128xbf16>
    %4 = vector.shape_cast %3 : vector<1x4x128xbf16> to vector<4x128xbf16>
    %cst_5 = arith.constant dense<0.000000e+00> : vector<288x128xf32>
    %5 = tpu.matmul %2, %4, %cst_5 {dimension_numbers = #tpu.dot_dimension_numbers<[1], [0], [0], [1], [0, 0, 1, 1], [], []>} : vector<288x4xbf16>, vector<4x128xbf16>, vector<288x128xf32> -> vector<288x128xf32>
    %6 = arith.addf %0, %5 : vector<288x128xf32>
    %c0_6 = arith.constant 0 : index
    %c1 = arith.constant 1 : index
    %c0_7 = arith.constant 0 : index
    %7 = vector.load %arg2[%c0_6, %c1, %c0_7] : memref<1x328x4xbf16, #tpu.memory_space<vmem>>, vector<1x288x4xbf16>
    %8 = vector.shape_cast %7 : vector<1x288x4xbf16> to vector<288x4xbf16>
    %c1_8 = arith.constant 1 : index
    %c0_9 = arith.constant 0 : index
    %c0_10 = arith.constant 0 : index
    %9 = vector.load %arg3[%c1_8, %c0_9, %c0_10] : memref<9x4x128xbf16, #tpu.memory_space<vmem>>, vector<1x4x128xbf16>
    %10 = vector.shape_cast %9 : vector<1x4x128xbf16> to vector<4x128xbf16>
    %cst_11 = arith.constant dense<0.000000e+00> : vector<288x128xf32>
    %11 = tpu.matmul %8, %10, %cst_11 {dimension_numbers = #tpu.dot_dimension_numbers<[1], [0], [0], [1], [0, 0, 1, 1], [], []>} : vector<288x4xbf16>, vector<4x128xbf16>, vector<288x128xf32> -> vector<288x128xf32>
    %12 = arith.addf %6, %11 : vector<288x128xf32>
    %c0_12 = arith.constant 0 : index
    %c2 = arith.constant 2 : index
    %c0_13 = arith.constant 0 : index
    %13 = vector.load %arg2[%c0_12, %c2, %c0_13] : memref<1x328x4xbf16, #tpu.memory_space<vmem>>, vector<1x288x4xbf16>
    %14 = vector.shape_cast %13 : vector<1x288x4xbf16> to vector<288x4xbf16>
    %c2_14 = arith.constant 2 : index
    %c0_15 = arith.constant 0 : index
    %c0_16 = arith.constant 0 : index
    %15 = vector.load %arg3[%c2_14, %c0_15, %c0_16] : memref<9x4x128xbf16, #tpu.memory_space<vmem>>, vector<1x4x128xbf16>
    %16 = vector.shape_cast %15 : vector<1x4x128xbf16> to vector<4x128xbf16>
    %cst_17 = arith.constant dense<0.000000e+00> : vector<288x128xf32>
    %17 = tpu.matmul %14, %16, %cst_17 {dimension_numbers = #tpu.dot_dimension_numbers<[1], [0], [0], [1], [0, 0, 1, 1], [], []>} : vector<288x4xbf16>, vector<4x128xbf16>, vector<288x128xf32> -> vector<288x128xf32>
    %18 = arith.addf %12, %17 : vector<288x128xf32>
    %c0_18 = arith.constant 0 : index
    %c18 = arith.constant 18 : index
    %c0_19 = arith.constant 0 : index
    %19 = vector.load %arg2[%c0_18, %c18, %c0_19] : memref<1x328x4xbf16, #tpu.memory_space<vmem>>, vector<1x288x4xbf16>
    %20 = vector.shape_cast %19 : vector<1x288x4xbf16> to vector<288x4xbf16>
    %c3 = arith.constant 3 : index
    %c0_20 = arith.constant 0 : index
    %c0_21 = arith.constant 0 : index
    %21 = vector.load %arg3[%c3, %c0_20, %c0_21] : memref<9x4x128xbf16, #tpu.memory_space<vmem>>, vector<1x4x128xbf16>
    %22 = vector.shape_cast %21 : vector<1x4x128xbf16> to vector<4x128xbf16>
    %cst_22 = arith.constant dense<0.000000e+00> : vector<288x128xf32>
    %23 = tpu.matmul %20, %22, %cst_22 {dimension_numbers = #tpu.dot_dimension_numbers<[1], [0], [0], [1], [0, 0, 1, 1], [], []>} : vector<288x4xbf16>, vector<4x128xbf16>, vector<288x128xf32> -> vector<288x128xf32>
    %24 = arith.addf %18, %23 : vector<288x128xf32>
    %c0_23 = arith.constant 0 : index
    %c19 = arith.constant 19 : index
    %c0_24 = arith.constant 0 : index
    %25 = vector.load %arg2[%c0_23, %c19, %c0_24] : memref<1x328x4xbf16, #tpu.memory_space<vmem>>, vector<1x288x4xbf16>
    %26 = vector.shape_cast %25 : vector<1x288x4xbf16> to vector<288x4xbf16>
    %c4 = arith.constant 4 : index
    %c0_25 = arith.constant 0 : index
    %c0_26 = arith.constant 0 : index
    %27 = vector.load %arg3[%c4, %c0_25, %c0_26] : memref<9x4x128xbf16, #tpu.memory_space<vmem>>, vector<1x4x128xbf16>
    %28 = vector.shape_cast %27 : vector<1x4x128xbf16> to vector<4x128xbf16>
    %cst_27 = arith.constant dense<0.000000e+00> : vector<288x128xf32>
    %29 = tpu.matmul %26, %28, %cst_27 {dimension_numbers = #tpu.dot_dimension_numbers<[1], [0], [0], [1], [0, 0, 1, 1], [], []>} : vector<288x4xbf16>, vector<4x128xbf16>, vector<288x128xf32> -> vector<288x128xf32>
    %30 = arith.addf %24, %29 : vector<288x128xf32>
    %c0_28 = arith.constant 0 : index
    %c20 = arith.constant 20 : index
    %c0_29 = arith.constant 0 : index
    %31 = vector.load %arg2[%c0_28, %c20, %c0_29] : memref<1x328x4xbf16, #tpu.memory_space<vmem>>, vector<1x288x4xbf16>
    %32 = vector.shape_cast %31 : vector<1x288x4xbf16> to vector<288x4xbf16>
    %c5 = arith.constant 5 : index
    %c0_30 = arith.constant 0 : index
    %c0_31 = arith.constant 0 : index
    %33 = vector.load %arg3[%c5, %c0_30, %c0_31] : memref<9x4x128xbf16, #tpu.memory_space<vmem>>, vector<1x4x128xbf16>
    %34 = vector.shape_cast %33 : vector<1x4x128xbf16> to vector<4x128xbf16>
    %cst_32 = arith.constant dense<0.000000e+00> : vector<288x128xf32>
    %35 = tpu.matmul %32, %34, %cst_32 {dimension_numbers = #tpu.dot_dimension_numbers<[1], [0], [0], [1], [0, 0, 1, 1], [], []>} : vector<288x4xbf16>, vector<4x128xbf16>, vector<288x128xf32> -> vector<288x128xf32>
    %36 = arith.addf %30, %35 : vector<288x128xf32>
    %c0_33 = arith.constant 0 : index
    %c36 = arith.constant 36 : index
    %c0_34 = arith.constant 0 : index
    %37 = vector.load %arg2[%c0_33, %c36, %c0_34] : memref<1x328x4xbf16, #tpu.memory_space<vmem>>, vector<1x288x4xbf16>
    %38 = vector.shape_cast %37 : vector<1x288x4xbf16> to vector<288x4xbf16>
    %c6 = arith.constant 6 : index
    %c0_35 = arith.constant 0 : index
    %c0_36 = arith.constant 0 : index
    %39 = vector.load %arg3[%c6, %c0_35, %c0_36] : memref<9x4x128xbf16, #tpu.memory_space<vmem>>, vector<1x4x128xbf16>
    %40 = vector.shape_cast %39 : vector<1x4x128xbf16> to vector<4x128xbf16>
    %cst_37 = arith.constant dense<0.000000e+00> : vector<288x128xf32>
    %41 = tpu.matmul %38, %40, %cst_37 {dimension_numbers = #tpu.dot_dimension_numbers<[1], [0], [0], [1], [0, 0, 1, 1], [], []>} : vector<288x4xbf16>, vector<4x128xbf16>, vector<288x128xf32> -> vector<288x128xf32>
    %42 = arith.addf %36, %41 : vector<288x128xf32>
    %c0_38 = arith.constant 0 : index
    %c37 = arith.constant 37 : index
    %c0_39 = arith.constant 0 : index
    %43 = vector.load %arg2[%c0_38, %c37, %c0_39] : memref<1x328x4xbf16, #tpu.memory_space<vmem>>, vector<1x288x4xbf16>
    %44 = vector.shape_cast %43 : vector<1x288x4xbf16> to vector<288x4xbf16>
    %c7 = arith.constant 7 : index
    %c0_40 = arith.constant 0 : index
    %c0_41 = arith.constant 0 : index
    %45 = vector.load %arg3[%c7, %c0_40, %c0_41] : memref<9x4x128xbf16, #tpu.memory_space<vmem>>, vector<1x4x128xbf16>
    %46 = vector.shape_cast %45 : vector<1x4x128xbf16> to vector<4x128xbf16>
    %cst_42 = arith.constant dense<0.000000e+00> : vector<288x128xf32>
    %47 = tpu.matmul %44, %46, %cst_42 {dimension_numbers = #tpu.dot_dimension_numbers<[1], [0], [0], [1], [0, 0, 1, 1], [], []>} : vector<288x4xbf16>, vector<4x128xbf16>, vector<288x128xf32> -> vector<288x128xf32>
    %48 = arith.addf %42, %47 : vector<288x128xf32>
    %c0_43 = arith.constant 0 : index
    %c38 = arith.constant 38 : index
    %c0_44 = arith.constant 0 : index
    %49 = vector.load %arg2[%c0_43, %c38, %c0_44] : memref<1x328x4xbf16, #tpu.memory_space<vmem>>, vector<1x288x4xbf16>
    %50 = vector.shape_cast %49 : vector<1x288x4xbf16> to vector<288x4xbf16>
    %c8 = arith.constant 8 : index
    %c0_45 = arith.constant 0 : index
    %c0_46 = arith.constant 0 : index
    %51 = vector.load %arg3[%c8, %c0_45, %c0_46] : memref<9x4x128xbf16, #tpu.memory_space<vmem>>, vector<1x4x128xbf16>
    %52 = vector.shape_cast %51 : vector<1x4x128xbf16> to vector<4x128xbf16>
    %cst_47 = arith.constant dense<0.000000e+00> : vector<288x128xf32>
    %53 = tpu.matmul %50, %52, %cst_47 {dimension_numbers = #tpu.dot_dimension_numbers<[1], [0], [0], [1], [0, 0, 1, 1], [], []>} : vector<288x4xbf16>, vector<4x128xbf16>, vector<288x128xf32> -> vector<288x128xf32>
    %54 = arith.addf %48, %53 : vector<288x128xf32>
    %c0_48 = arith.constant 0 : index
    %c0_49 = arith.constant 0 : index
    %c0_50 = arith.constant 0 : index
    %55 = vector.load %arg5[%c0_48, %c0_49, %c0_50] : memref<1x288x128xf32, #tpu.memory_space<vmem>>, vector<1x288x128xf32>
    %56 = vector.shape_cast %55 : vector<1x288x128xf32> to vector<288x128xf32>
    %57 = vector.shape_cast %54 : vector<288x128xf32> to vector<1x288x128xf32>
    tpu.vector_store %arg5[%c0_48, %c0_49, %c0_50], %57 {strides = array<i32>} : memref<1x288x128xf32, #tpu.memory_space<vmem>>, vector<1x288x128xf32>,
    %c0_51 = arith.constant 0 : index
    %c0_52 = arith.constant 0 : index
    %58 = vector.load %arg4[%c0_51, %c0_52] : memref<288x1xf32, #tpu.memory_space<vmem>>, vector<288x1xf32>
    %59 = vector.broadcast %58 : vector<288x1xf32> to vector<288x128xf32>
    %60 = arith.mulf %54, %59 : vector<288x128xf32>
    %cst_53 = arith.constant dense<0.000000e+00> : vector<128xf32>
    %61 = vector.multi_reduction <add>, %60, %cst_53 [0] : vector<288x128xf32> to vector<128xf32>
    %62 = vector.shape_cast %61 : vector<128xf32> to vector<1x128xf32>
    %63 = arith.mulf %60, %54 : vector<288x128xf32>
    %cst_54 = arith.constant dense<0.000000e+00> : vector<128xf32>
    %64 = vector.multi_reduction <add>, %63, %cst_54 [0] : vector<288x128xf32> to vector<128xf32>
    %65 = vector.shape_cast %64 : vector<128xf32> to vector<1x128xf32>
    %66 = vector.shape_cast %62 : vector<1x128xf32> to vector<1x128xf32>
    %67 = vector.broadcast %66 : vector<1x128xf32> to vector<8x128xf32>
    %c0_55 = arith.constant 0 : index
    %c0_56 = arith.constant 0 : index
    %c0_57 = arith.constant 0 : index
    %68 = vector.load %arg6[%c0_55, %c0_56, %c0_57] : memref<1x8x128xf32, #tpu.memory_space<vmem>>, vector<1x8x128xf32>
    %69 = vector.shape_cast %68 : vector<1x8x128xf32> to vector<8x128xf32>
    %70 = vector.shape_cast %67 : vector<8x128xf32> to vector<1x8x128xf32>
    tpu.vector_store %arg6[%c0_55, %c0_56, %c0_57], %70 {strides = array<i32>} : memref<1x8x128xf32, #tpu.memory_space<vmem>>, vector<1x8x128xf32>,
    %71 = vector.shape_cast %65 : vector<1x128xf32> to vector<1x128xf32>
    %72 = vector.broadcast %71 : vector<1x128xf32> to vector<8x128xf32>
    %c0_58 = arith.constant 0 : index
    %c0_59 = arith.constant 0 : index
    %c0_60 = arith.constant 0 : index
    %73 = vector.load %arg7[%c0_58, %c0_59, %c0_60] : memref<1x8x128xf32, #tpu.memory_space<vmem>>, vector<1x8x128xf32>
    %74 = vector.shape_cast %73 : vector<1x8x128xf32> to vector<8x128xf32>
    %75 = vector.shape_cast %72 : vector<8x128xf32> to vector<1x8x128xf32>
    tpu.vector_store %arg7[%c0_58, %c0_59, %c0_60], %75 {strides = array<i32>} : memref<1x8x128xf32, #tpu.memory_space<vmem>>, vector<1x8x128xf32>,
    return
  }
  func.func @transform_0(%arg0: i32, %arg1: i32) -> (i32, i32, i32) {
    %c0_i32 = arith.constant 0 : i32
    %c0_i32_0 = arith.constant 0 : i32
    %c0_i32_1 = arith.constant 0 : i32
    return %arg0, %c0_i32, %c0_i32_0 : i32, i32, i32
  }
  func.func @transform_1(%arg0: i32, %arg1: i32) -> (i32, i32, i32) {
    %c0_i32 = arith.constant 0 : i32
    %c0_i32_0 = arith.constant 0 : i32
    %c0_i32_1 = arith.constant 0 : i32
    return %c0_i32, %c0_i32_0, %arg1 : i32, i32, i32
  }
  func.func @transform_2(%arg0: i32, %arg1: i32) -> (i32, i32) {
    %c0_i32 = arith.constant 0 : i32
    %c0_i32_0 = arith.constant 0 : i32
    %c0_i32_1 = arith.constant 0 : i32
    return %c0_i32, %c0_i32_0 : i32, i32
  }
  func.func @transform_3(%arg0: i32, %arg1: i32) -> (i32, i32, i32) {
    %c0_i32 = arith.constant 0 : i32
    %c0_i32_0 = arith.constant 0 : i32
    return %arg0, %c0_i32, %arg1 : i32, i32, i32
  }
  func.func @transform_4(%arg0: i32, %arg1: i32) -> (i32, i32, i32) {
    %c0_i32 = arith.constant 0 : i32
    %c0_i32_0 = arith.constant 0 : i32
    return %arg0, %c0_i32, %arg1 : i32, i32, i32
  }
  func.func @transform_5(%arg0: i32, %arg1: i32) -> (i32, i32, i32) {
    %c0_i32 = arith.constant 0 : i32
    %c0_i32_0 = arith.constant 0 : i32
    return %arg0, %c0_i32, %arg1 : i32, i32, i32
  }
}

</mosaic_0001>

<bundles_post_ra>
// kernel: tpu_custom_call.1
= control target key start
LH: loop header
LB: loop body
LE: loop exit
PB: predicated region body
PF: predicated region fallthrough
CT: control target
= control target key end

     0   :  { %11 = vsyncpa [#allocation3], 0  ;;  %s5747_s0 = inlined_call_operand.vmem [shape: bf16[2,328,4], index: 0, kind: input, shape index: {}]   ;;  %s5748_s1 = inlined_call_operand.vmem [shape: bf16[9,4,128], index: 1, kind: input, shape index: {}]   ;;  %s5749_s2 = inlined_call_operand.vmem [shape: f32[288,1], index: 2, kind: input, shape index: {}]   ;;  %s5750_s3 = inlined_call_operand.hbm [shape: f32[2,288,128], index: 3, kind: output, shape index: {0}]   ;;  %s5751_s4 = inlined_call_operand.hbm [shape: f32[2,8,128], index: 4, kind: output, shape index: {1}]   ;;  %s5752_s5 = inlined_call_operand.hbm [shape: f32[2,8,128], index: 5, kind: output, shape index: {2}]  }
   0x1   :  { %13 = vsyncpa [#allocation3 + $0x1], 0 }
   0x2   :  { %14 = vsyncpa [#allocation5], 0 }
   0x3   :  { %16 = vsyncpa [#allocation5 + $0x1], 0  ;;  %s4358_s18 = smov 0   ;;  %s4360_s19 = smov 0  }
   0x4   :  { %s4362_s20 = smov 0   ;;  %s4364_s21 = smov 0  }
   0x5   :  { %s4366_s22 = smov 0   ;;  %s4368_s23 = smov 0  }
   0x6 LB: > { %s3640_s24 = sadd.s32 4294967295, %s4323_s23   ;;  %s3641_s25 = sadd.s32 4294967294, %s4323_s23   ;;  %s4323_s23 = sphi %s4368_s23, %s22_s23   ;;  %s4319_s22 = sphi %s4366_s22, %s5787_s22   ;;  %s4315_s21 = sphi %s4364_s21, %s5786_s21   ;;  %s4311_s20 = sphi %s4362_s20, %s5785_s20   ;;  %s4307_s19 = sphi %s4360_s19, %s5784_s19   ;;  %s4303_s18 = sphi %s4358_s18, %s5783_s18  }
   0x7   : > { %s34_s26 = sadd.s32 1, %s4319_s22  ;;  %s116_s27 = sadd.s32 1, %s4311_s20 }
   0x8   : > { %p36_p0 = scmp.ge.s32.totalorder %s34_s26, 2  ;;  %p126_p1 = scmp.ne.s32.totalorder %s4311_s20, %s4307_s19 }
   0x9   : > { %p127_p2 = scmp.eq.s32.totalorder %s3640_s24, 1  ;;  %p132_p3 = scmp.ne.s32.totalorder %s4307_s19, %s4303_s18 }
   0xa   : > { %s5789_s26 = smov (%p36_p0, %s34_s26), 0  ;;  %p133_p5 = scmp.eq.s32.totalorder %s3641_s25, 1 }
   0xb   : > { %p4400_p4 = por %p127_p2, %p126_p1  ;;  %s111_s29 = ssub.s32 %s4319_s22, %s5789_s26 }
   0xc   : > { %p3645_p6 = scmp.ge.s32.totalorder %s4323_s23, 1  ;;  %p114_p7 = scmp.eq.s32.totalorder %s111_s29, 0 }
   0xd   : > { %p4409_p8 = por %p133_p5, %p132_p3  ;;  %p225_p9 = scmp.lt.s32.totalorder %s4323_s23, 3 }
   0xe   : > { %s4415_s6 = scalar_select %p114_p7, %s4311_s20, %s116_s27  }
   0xf   : > { %p226_p10 = pnand %p3645_p6, %p225_p9 }
  0x11   : > { %229 = sbr.rel (%p226_p10) target bundleno = 858 (0x35a), region = 32 }
  0x16   : > { %v3649_v0 = vld [vmem:[%s5748_s1 + $0x2] sm:$0x3]  ;;  %vm614_vm0 = vcmask 1041408   ;;  %p267_p11 = scmp.lt.s32.totalorder %s4315_s21, 1  ;;  %v3754_v2 = vld [vmem:[%s5748_s1 + $0x4] sm:$0x3] }
  0x17   : > { %v616_v1 = vsel %vm614_vm0, %v3649_v0, 0  ;;  %v313_v3 = vld [vmem:[%s5748_s1] sm:$0x3]  ;;  %v954_v4 = vsel %vm614_vm0, %v3754_v2, 0  ;;  %v3860_v6 = vld [vmem:[%s5748_s1 + $0x8] sm:$0x3] }
  0x18   : > { %4088 = vmatpush.bf16.msra.mxu1 %v616_v1  ;;  %4089 = vmatpush.bf16.msra.mxu2 %v616_v1  ;;  %s268_s13 = scalar_select %p267_p11, %s4315_s21, 1  ;;  %v754_v5 = vsel %vm614_vm0, %v313_v3, 0  ;;  %v1684_v7 = vsel %vm614_vm0, %v3860_v6, 0  ;;  %vm410_vm1 = vsmask.f32 7424  ;;  %vm559_vm2 = vcmask 31744  }
  0x19   : > { %625 = vmatpush.bf16.msra.mxu0 %v616_v1  ;;  %4090 = vmatpush.bf16.msra.mxu3 %v616_v1  ;;  %v3773_v45 = vld [vmem:[%s5748_s1 + $0x6] sm:$0x3]  ;;  %vm861_vm3 = vcmask 1046528   ;;  %vm1458_vm4 = vsmask.f32 6400  ;;  %vm1827_vm6 = vcmask 1045504  }
  0x1a   : > { %s4092_s16 = smul.u32 164, %s268_s13  ;;  %v1315_v53 = vsel %vm614_vm0, %v3773_v45, 0  ;;  %vm2424_vm5 = vsmask.f32 5376  ;;  %vm2793_vm7 = vcmask 1044480   ;;  %s5245_s15 = sand.u32 1, %s4307_s19  }
  0x1b   : > { %s3432_s9 = scalar_lea.sflag [#allocation3], %s5245_s15 }
  0x1c   : > { %963 = vmatpush.bf16.msrb.mxu2 %v954_v4  ;;  %763 = vmatpush.bf16.msrb.mxu1 %v754_v5  ;;  %s4438_s29 = scalar_lea.vmem %s5747_s0, %s4092_s16  ;;  %s4091_s16 = smul.u32 288, %s5245_s15 }
  0x1d   : > { %1693 = vmatpush.bf16.msrb.mxu0 %v1684_v7  ;;  %v4441_v8 = vld [vmem:[%s4438_s29 + $0x28] sm:$0xff]  ;;  %v4444_v9 = vld [vmem:[%s4438_s29 + $0x30] sm:$0xff]  ;;  %v4450_v11 = vld [vmem:[%s4438_s29 + $0x58] sm:$0xff]  ;;  %1324 = vmatpush.bf16.msrb.mxu3 %v1315_v53 }
  0x1e   : > { %v4447_v10 = vld [vmem:[%s4438_s29 + $0x50] sm:$0xff]  ;;  %v4453_v12 = vld [vmem:[%s4438_s29] sm:$0xff]   ;;  %v4456_v13 = vld [vmem:[%s4438_s29 + $0x8] sm:$0xff]  ;;  %v451_v14 = vshll.u32 %v4441_v8, 16  ;;  %v455_v15 = vshrl.u32 %v4441_v8, 16  ;;  %v459_v16 = vshll.u32 %v4444_v9, 16 }
  0x1f   : > { %v491_v17 = vshll.u32 %v4447_v10, 16  ;;  %v495_v18 = vshrl.u32 %v4447_v10, 16  ;;  %v499_v19 = vshll.u32 %v4450_v11, 16  ;;  %v412_v20 = vshrl.u32 %v4453_v12, 16  ;;  %v4474_v31 = vld [vmem:[%s4438_s29 + $0x78] sm:$0xff]  ;;  %v4045_v32 = vld [vmem:[%s4438_s29 + $0x80] sm:$0xff] }
  0x20   : > { %v414_v21 = vshll.u32 %v4453_v12, 16  ;;  %v4466_v22 = vrot.slane %v451_v14, 1  ;;  %v461_v23 = vrot.slane %v459_v16, 1  ;;  %v419_v25 = vshll.u32 %v4456_v13, 16  ;;  %v4483_v37 = vld [vmem:[%s4438_s29 + $0x38] sm:$0xff]  ;;  %v4487_v38 = vld [vmem:[%s4438_s29 + $0x60] sm:$0xff] }
  0x21   : > { %v4468_v24 = vrot.slane %v491_v17, 1  ;;  %v501_v26 = vrot.slane %v499_v19, 1  ;;  %v531_v39 = vshll.u32 %v4474_v31, 16  ;;  %v535_v40 = vshrl.u32 %v4474_v31, 16  ;;  %v4492_v42 = vld [vmem:[%s4438_s29 + $0x10] sm:$0xff]  ;;  %v4046_v59 = vld [vmem:[%s4438_s29 + $0x88] sm:$0xff] }
  0x22   : > { %v416_v27 = vrot.slane %v414_v21, 1  ;;  %v457_v28 = vor.u32 %v455_v15, %v4466_v22  ;;  %v421_v30 = vrot.slane %v419_v25, 1  ;;  %v539_v41 = vshll.u32 %v4045_v32, 16  ;;  %v4511_v60 = vld [vmem:[%s4438_s29 + $0x48] sm:$0xff]  ;;  %v4520_v5 = vld [vmem:[%s4438_s29 + $0x40] sm:$0xff]  ;;  %v4528_v17 = vld [vmem:[%s4438_s29 + $0x18] sm:$0xff] }
  0x23   : > { %v497_v29 = vor.u32 %v495_v18, %v4468_v24  ;;  %v4494_v43 = vrot.slane %v531_v39, 1  ;;  %v463_v46 = vshrl.u32 %v4444_v9, 16  ;;  %v467_v47 = vshll.u32 %v4483_v37, 16  ;;  %v4523_v6 = vld [vmem:[%s4438_s29 + $0x68] sm:$0xff]  ;;  %v314_v18 = vld [vmem:[%s4438_s29 + $0x90] sm:$0x1] }
  0x24   : > { %v417_v33 = vor.u32 %v416_v27, %v412_v20  ;;  %v462_v34 = vsel %vm410_vm1, %v457_v28, %v461_v23  ;;  %v541_v44 = vrot.slane %v539_v41, 1  ;;  %v503_v48 = vshrl.u32 %v4450_v11, 16  ;;  %v4537_v27 = vld [vmem:[%s4438_s29 + $0x20] sm:$0xff]  ;;  %s5270_s7 = scalar_lea.vmem [#allocation2], %s4091_s16 }
  0x25   : > { %v502_v35 = vsel %vm410_vm1, %v497_v29, %v501_v26  ;;  %3723 = vmatmul.msk.bf16.vlgmr.msra.gmra.mxu1 %vm559_vm2, %v462_v34  ;;  %v507_v49 = vshll.u32 %v4487_v38, 16  ;;  %v537_v50 = vor.u32 %v535_v40, %v4494_v43  ;;  %v423_v51 = vshrl.u32 %v4456_v13, 16  ;;  %s3455_s27 = sshll.u32 %s5270_s7, 4  ;;  %s3456_s27 = int_to_ptr.vmem [resolvable:$true] %s3455_s27 }
  0x26   : > { %3728 = vmatmul.msk.bf16.vlgmr.msra.gmra.mxu2 %vm559_vm2, %v502_v35  ;;  %v422_v36 = vsel %vm410_vm1, %v417_v33, %v421_v30  ;;  %v427_v52 = vshll.u32 %v4492_v42, 16  ;;  %v465_v55 = vor.u32 %v463_v46, %v461_v23  ;;  %v469_v56 = vrot.slane %v467_v47, 1 }
  0x27   : > { %3718 = vmatmul.msk.bf16.vlgmr.msra.gmra.mxu0 %vm559_vm2, %v422_v36  ;;  %v542_v54 = vsel %vm410_vm1, %v537_v50, %v541_v44  ;;  %v505_v57 = vor.u32 %v503_v48, %v501_v26  ;;  %v509_v58 = vrot.slane %v507_v49, 1  ;;  %v425_v61 = vor.u32 %v423_v51, %v421_v30 }
  0x28   : > { %3733 = vmatmul.msk.bf16.vlgmr.msra.gmra.mxu3 %vm559_vm2, %v542_v54  ;;  %v429_v62 = vrot.slane %v427_v52, 1  ;;  %v470_v63 = vsel %vm410_vm1, %v465_v55, %v469_v56  ;;  %v543_v1 = vshrl.u32 %v4045_v32, 16  ;;  %v547_v2 = vshll.u32 %v4046_v59, 16  ;;  %v4558_v52 = vld [vmem:[%s4438_s29 + $0x70] sm:$0xff] }
  0x29   : > { %v510_v0 = vsel %vm410_vm1, %v505_v57, %v509_v58  ;;  %v483_v3 = vshll.u32 %v4511_v60, 16  ;;  %v487_v16 = vshrl.u32 %v4511_v60, 16  ;;  %v471_v20 = vshrl.u32 %v4483_v37, 16 }
  0x2a   : > { %v430_v4 = vsel %vm410_vm1, %v425_v61, %v429_v62  ;;  %v545_v7 = vor.u32 %v543_v1, %v541_v44  ;;  %v549_v14 = vrot.slane %v547_v2, 1  ;;  %v475_v21 = vshll.u32 %v4520_v5, 16 }
  0x2b   : > { %v485_v15 = vrot.slane %v483_v3, 1  ;;  %v511_v23 = vshrl.u32 %v4487_v38, 16  ;;  %v515_v25 = vshll.u32 %v4523_v6, 16  ;;  %v390_v28 = vunpack.c.l.b16 %v314_v18 }
  0x2c   : > { %v550_v26 = vsel %vm410_vm1, %v545_v7, %v549_v14  ;;  %v431_v30 = vshrl.u32 %v4492_v42, 16  ;;  %v435_v32 = vshll.u32 %v4528_v17, 16  ;;  %v473_v33 = vor.u32 %v471_v20, %v469_v56  ;;  %v4047_v7 = vld [vmem:[%s4438_s29 + $0x10] sm:$0xff] }
  0x2d   : > { %v489_v19 = vor.u32 %v487_v16, %v485_v15  ;;  %v477_v34 = vrot.slane %v475_v21, 1  ;;  %v513_v35 = vor.u32 %v511_v23, %v509_v58  ;;  %v517_v36 = vrot.slane %v515_v25, 1  ;;  %v3898_v21 = vld [vmem:[%s5748_s1 + $0xc] sm:$0x3]  ;;  %v3985_v25 = vld [vmem:[%s5748_s1 + $0xe] sm:$0x3] }
  0x2e   : > { %v443_v39 = vshll.u32 %v4537_v27, 16  ;;  %v4547_v40 = vpack.c.b16 %v390_v28, %v390_v28  ;;  %v433_v41 = vor.u32 %v431_v30, %v429_v62  ;;  %v437_v44 = vrot.slane %v435_v32, 1  ;;  %v1091_v62 = vld [vmem:[%s4438_s29 + $0x8] sm:$0xe]  ;;  %v4004_v32 = vld [vmem:[%s5748_s1 + $0x10] sm:$0x3] }
  0x2f   : > { %v4541_v29 = vsel %vm410_vm1, %v489_v19, %v4468_v24  ;;  %v478_v24 = vsel %vm410_vm1, %v473_v33, %v477_v34  ;;  %v518_v45 = vsel %vm410_vm1, %v513_v35, %v517_v36  ;;  %v551_v47 = vshrl.u32 %v4046_v59, 16 }
  0x30   : > { %v445_v46 = vrot.slane %v443_v39, 1  ;;  %v555_v48 = vshll.u32 %v4547_v40, 16  ;;  %v447_v49 = vshrl.u32 %v4537_v27, 16  ;;  %v438_v50 = vsel %vm410_vm1, %v433_v41, %v437_v44  ;;  %v4048_v41 = vld [vmem:[%s4438_s29 + $0x18] sm:$0xff] }
  0x31   : > { %v553_v53 = vor.u32 %v551_v47, %v549_v14  ;;  %v479_v56 = vshrl.u32 %v4520_v5, 16  ;;  %v519_v57 = vshrl.u32 %v4523_v6, 16  ;;  %v523_v58 = vshll.u32 %v4558_v52, 16 }
  0x32   : > { %v449_v51 = vor.u32 %v447_v49, %v445_v46  ;;  %v557_v54 = vrot.slane %v555_v48, 1  ;;  %v439_v61 = vshrl.u32 %v4528_v17, 16  ;;  %v1167_v3 = vunpack.c.l.b16 %v1091_v62 }
  0x33   : > { %v521_v1 = vor.u32 %v519_v57, %v517_v36  ;;  %v525_v2 = vrot.slane %v523_v58, 1  ;;  %v1224_v20 = vrot.slane %v4047_v7, 1  ;;  %v2650_v28 = vsel %vm614_vm0, %v3985_v25, 0 }
  0x34   : > { %v454_v55 = vsel %vm410_vm1, %v449_v51, %v4466_v22  ;;  %v558_v59 = vsel %vm410_vm1, %v553_v53, %v557_v54  ;;  %2659 = vmatpush.bf16.msra.mxu3 %v2650_v28  ;;  %v2886_v33 = vsel %vm614_vm0, %v4004_v32, 0  ;;  %v1468_v48 = vshrl.u32 %v4047_v7, 16 }
  0x35   : > { %3724 = vmatmul.msk.bf16.gmra.mxu1 %vm559_vm2, %v470_v63  ;;  %v4569_v63 = vld [vmem:[%s4438_s29 + $0xc] sm:$0xf]  ;;  %v526_v16 = vsel %vm410_vm1, %v521_v1, %v525_v2  ;;  %2895 = vmatpush.bf16.msra.mxu0 %v2886_v33  ;;  %v1471_v49 = vshll.u32 %v4047_v7, 16  ;;  %v1477_v1 = vshrl.u32 %v4048_v41, 16  ;;  %v867_v28 = vrot.slane %v4528_v17, 1  ;;  %v4051_v33 = vld [vmem:[%s4438_s29 + $0x30] sm:$0xff] }
  0x36   : > { %3729 = vmatmul.msk.bf16.gmra.mxu2 %vm559_vm2, %v510_v0  ;;  %v481_v0 = vor.u32 %v479_v56, %v477_v34  ;;  %v5753_v22 = vunpack.c.l.b16 %v4569_v63  ;;  %v527_v34 = vshrl.u32 %v4558_v52, 16  ;;  %v1470_v54 = vrot.slane %v1468_v48, 1 }
  0x37   : > { %3719 = vmatmul.msk.bf16.gmra.mxu0 %vm559_vm2, %v430_v4  ;;  %v441_v4 = vor.u32 %v439_v61, %v437_v44  ;;  %v4085_v44 = vld [vmem:[%s4438_s29] sm:$0xf0]  ;;  %v1473_v56 = vrot.slane %v1471_v49, 2 }
  0x38   : > { %3734 = vmatmul.msk.bf16.gmra.mxu3 %vm559_vm2, %v550_v26  ;;  %v486_v14 = vsel %vm410_vm1, %v481_v0, %v485_v15  ;;  %v1204_v18 = vpack.c.b16 %v5753_v22, %v1167_v3  ;;  %v2281_v15 = vsel %vm614_vm0, %v3898_v21, 0  ;;  %v3879_v26 = vld [vmem:[%s5748_s1 + $0xa] sm:$0x3]  ;;  %v529_v36 = vor.u32 %v527_v34, %v525_v2  ;;  %v4049_v61 = vld [vmem:[%s4438_s29 + $0x20] sm:$0xff] }
  0x39   : > { %v446_v19 = vsel %vm410_vm1, %v441_v4, %v445_v46  ;;  %2290 = vmatpush.bf16.msra.mxu2 %v2281_v15  ;;  %v1920_v30 = vsel %vm614_vm0, %v3879_v26, 0  ;;  %v1474_v58 = vor.u32 %v1473_v56, %v1470_v54  ;;  %v1228_v0 = vrot.slane %v4049_v61, 1  ;;  %v4057_v22 = vld [vmem:[%s4438_s29 + $0x60] sm:$0xff] }
  0x3a   : > { %v1223_v23 = vrot.slane %v1204_v18, 1  ;;  %1929 = vmatpush.bf16.msra.mxu1 %v1920_v30  ;;  %v534_v39 = vsel %vm410_vm1, %v529_v36, %v4494_v43  ;;  %v1460_v46 = vshrl.u32 %v1204_v18, 16  ;;  %v1463_v47 = vshll.u32 %v1204_v18, 16 }
  0x3b   : > { %v1480_v2 = vshll.u32 %v4048_v41, 16  ;;  %v1479_v4 = vrot.slane %v1477_v1, 1  ;;  %v1486_v21 = vshrl.u32 %v4049_v61, 16  ;;  %v1232_v34 = vrot.slane %v4051_v33, 1  ;;  %v4053_v1 = vld [vmem:[%s4438_s29 + $0x40] sm:$0xff] }
  0x3c   : > { %v1225_v35 = vsel %vm861_vm3, %v1223_v23, %v1224_v20  ;;  %v1462_v43 = vrot.slane %v1460_v46, 1  ;;  %v1465_v53 = vrot.slane %v1463_v47, 2  ;;  %v1489_v23 = vshll.u32 %v4049_v61, 16  ;;  %v4052_v47 = vld [vmem:[%s4438_s29 + $0x38] sm:$0xff] }
  0x3d   : > { %v1482_v7 = vrot.slane %v1480_v2, 2  ;;  %v1488_v25 = vrot.slane %v1486_v21, 1 }
  0x3e   : > { %v1466_v57 = vor.u32 %v1465_v53, %v1462_v43  ;;  %v1491_v26 = vrot.slane %v1489_v23, 2  ;;  %v1507_v43 = vshll.u32 %v4051_v33, 16  ;;  %v873_v23 = vrot.slane %v4444_v9, 1 }
  0x40   : > { %v1475_v62 = vsel %vm1458_vm4, %v1466_v57, %v1474_v58  ;;  %v1492_v30 = vor.u32 %v1491_v26, %v1488_v25  ;;  %v1509_v57 = vrot.slane %v1507_v43, 2 }
  0x45   : > { %3725 = vmatmul.msk.bf16.gmra.mxu1 %vm559_vm2, %v478_v24  ;;  %v1226_v24 = vrot.slane %v4048_v41, 1 }
  0x46   : > { %3730 = vmatmul.msk.bf16.gmra.mxu2 %vm559_vm2, %v518_v45  ;;  %v4086_v45 = vld [vmem:[%s4438_s29] sm:$0xe] }
  0x47   : > { %3720 = vmatmul.msk.bf16.gmra.mxu0 %vm559_vm2, %v438_v50  ;;  %v4087_v50 = vor.u32 %v4086_v45, %v4085_v44  ;;  %v1227_v51 = vsel %vm861_vm3, %v1224_v20, %v1226_v24  ;;  %v1229_v3 = vsel %vm861_vm3, %v1226_v24, %v1228_v0  ;;  %v869_v24 = vrot.slane %v4537_v27, 1 }
  0x48   : > { %3735 = vmatmul.msk.bf16.gmra.mxu3 %vm559_vm2, %v558_v59 }
  0x55   : > { %3726 = vmatmul.msk.bf16.gmra.mxu1 %vm559_vm2, %v486_v14  ;;  %v865_v14 = vrot.slane %v4492_v42, 1 }
  0x56   : > { %3731 = vmatmul.msk.bf16.gmra.mxu2 %vm559_vm2, %v526_v16  ;;  %v1483_v16 = vor.u32 %v1482_v7, %v1479_v4  ;;  %v1236_v4 = vrot.slane %v4053_v1, 1  ;;  %v1513_v7 = vshrl.u32 %v4052_v47, 16 }
  0x57   : > { %3721 = vmatmul.msk.bf16.gmra.mxu0 %vm559_vm2, %v446_v19  ;;  %v868_v32 = vsel %vm861_vm3, %v865_v14, %v867_v28 }
  0x58   : > { %3842 = vmatmul.msk.bf16.vlgmr.msrb.gmra.mxu3 %vm559_vm2, %v1225_v35  ;;  %v1484_v19 = vsel %vm1458_vm4, %v1474_v58, %v1483_v16  ;;  %v1515_v21 = vrot.slane %v1513_v7, 1 }
  0x65   : > { %3727 = vmatmul.msk.bf16.gmra.mxu1 %vm559_vm2, %v4541_v29  ;;  %v862_v29 = vrot.slane %v4087_v50, 1  ;;  %v1234_v50 = vrot.slane %v4052_v47, 1 }
  0x66   : > { %3732 = vmatmul.msk.bf16.gmra.mxu2 %vm559_vm2, %v534_v39 }
  0x67   : > { %3722 = vmatmul.msk.bf16.gmra.mxu0 %vm559_vm2, %v454_v55  ;;  %v863_v55 = vrot.slane %v4456_v13, 1  ;;  %v1235_v56 = vsel %vm861_vm3, %v1232_v34, %v1234_v50 }
  0x68   : > { %3843 = vmatmul.msk.bf16.gmra.mxu3 %vm559_vm2, %v1227_v51  ;;  %v1504_v51 = vshrl.u32 %v4051_v33, 16 }
  0x69   : > { %v864_v59 = vsel %vm861_vm3, %v862_v29, %v863_v55  ;;  %v866_v18 = vsel %vm861_vm3, %v863_v55, %v865_v14  ;;  %v1516_v14 = vshll.u32 %v4052_v47, 16  ;;  %v875_v47 = vrot.slane %v4483_v37, 1 }
  0x6a   : > { %v1506_v55 = vrot.slane %v1504_v51, 1 }
  0x6c   : > { %v1510_v58 = vor.u32 %v1509_v57, %v1506_v55  ;;  %v4055_v55 = vld [vmem:[%s4438_s29 + $0x50] sm:$0xff] }
  0x75   : > { %3736 = vmatmul.msk.bf16.vlgmr.msrb.gmra.mxu1 %vm559_vm2, %v4453_v12  ;;  %v4050_v12 = vld [vmem:[%s4438_s29 + $0x28] sm:$0xff] }
  0x76   : > { %3755 = vmatmul.msk.bf16.vlgmr.msrb.gmra.mxu2 %vm559_vm2, %v864_v59  ;;  %v1230_v20 = vrot.slane %v4050_v12, 1  ;;  %v1495_v35 = vshrl.u32 %v4050_v12, 16  ;;  %v1498_v36 = vshll.u32 %v4050_v12, 16 }
  0x77   : > { %3861 = vmatmul.msk.bf16.vlgmr.msrb.gmra.mxu0 %vm559_vm2, %v1475_v62 }
  0x78   : > { %3844 = vmatmul.msk.bf16.gmra.mxu3 %vm559_vm2, %v1229_v3  ;;  %v1231_v15 = vsel %vm861_vm3, %v1228_v0, %v1230_v20  ;;  %v1233_v39 = vsel %vm861_vm3, %v1230_v20, %v1232_v34  ;;  %v1497_v41 = vrot.slane %v1495_v35, 1  ;;  %v1500_v44 = vrot.slane %v1498_v36, 2 }
  0x79   : > { %v1522_v35 = vshrl.u32 %v4053_v1, 16  ;;  %v1525_v36 = vshll.u32 %v4053_v1, 16 }
  0x7a   : > { %v1501_v45 = vor.u32 %v1500_v44, %v1497_v41 }
  0x7c   : > { %v1502_v49 = vsel %vm1458_vm4, %v1492_v30, %v1501_v45  ;;  %v1511_v3 = vsel %vm1458_vm4, %v1501_v45, %v1510_v58 }
  0x85   : > { %3737 = vmatmul.msk.bf16.gmra.mxu1 %vm559_vm2, %v4456_v13  ;;  %v1493_v13 = vsel %vm1458_vm4, %v1483_v16, %v1492_v30 }
  0x86   : > { %3756 = vmatmul.msk.bf16.gmra.mxu2 %vm559_vm2, %v866_v18 }
  0x87   : > { %3862 = vmatmul.msk.bf16.gmra.mxu0 %vm559_vm2, %v1484_v19  ;;  %v1237_v19 = vsel %vm861_vm3, %v1234_v50, %v1236_v4 }
  0x88   : > { %3845 = vmatmul.msk.bf16.gmra.mxu3 %vm559_vm2, %v1231_v15 }
  0x95   : > { %3738 = vmatmul.msk.bf16.gmra.mxu1 %vm559_vm2, %v4492_v42  ;;  %v870_v42 = vsel %vm861_vm3, %v867_v28, %v869_v24 }
  0x96   : > { %3757 = vmatmul.msk.bf16.gmra.mxu2 %vm559_vm2, %v868_v32  ;;  %v4054_v32 = vld [vmem:[%s4438_s29 + $0x48] sm:$0xff] }
  0x97   : > { %3863 = vmatmul.msk.bf16.gmra.mxu0 %vm559_vm2, %v1493_v13  ;;  %v1238_v34 = vrot.slane %v4054_v32, 1  ;;  %v1534_v1 = vshll.u32 %v4054_v32, 16 }
  0x98   : > { %3846 = vmatmul.msk.bf16.gmra.mxu3 %vm559_vm2, %v1233_v39 }
  0xa2   : > { %v4643_v46 = vpop.f32.mrf.mxu1 }
  0xa4   : > { %v4647_v48 = vpop.f32.mrf.mxu0 }
  0xa5   : > { %3739 = vmatmul.msk.bf16.gmra.mxu1 %vm559_vm2, %v4528_v17  ;;  %v871_v17 = vrot.slane %v4441_v8, 1 }
  0xa6   : > { %3758 = vmatmul.msk.bf16.gmra.mxu2 %vm559_vm2, %v870_v42  ;;  %v1524_v42 = vrot.slane %v1522_v35, 1  ;;  %v4056_v35 = vld [vmem:[%s4438_s29 + $0x58] sm:$0xff] }
  0xa7   : > { %3864 = vmatmul.msk.bf16.gmra.mxu0 %vm559_vm2, %v1502_v49  ;;  %v872_v0 = vsel %vm861_vm3, %v869_v24, %v871_v17  ;;  %v874_v30 = vsel %vm861_vm3, %v871_v17, %v873_v23  ;;  %v1239_v24 = vsel %vm861_vm3, %v1236_v4, %v1238_v34 }
  0xa8   : > { %3847 = vmatmul.msk.bf16.gmra.mxu3 %vm559_vm2, %v1235_v56  ;;  %v876_v56 = vsel %vm861_vm3, %v873_v23, %v875_v47 }
  0xa9   : > { %v4654_v53 = vpop.f32.mrf.mxu2 }
  0xaa   : > { %v4656_v54 = vpop.f32.mrf.mxu1 }
  0xab   : > { %v4665_v61 = vpop.f32.mrf.mxu3 }
  0xac   : > { %v4659_v29 = vpop.f32.mrf.mxu0  ;;  %5758 = vst [vmem:[#allocation9_spill] sm:$0xff] %v4665_v61 }
  0xb1   : > { %v4663_v59 = vpop.f32.mrf.mxu2 }
  0xb2   : > { %v4667_v62 = vpop.f32.mrf.mxu1 }
  0xb3   : > { %v4680_v18 = vpop.f32.mrf.mxu3 }
  0xb4   : > { %v4671_v2 = vpop.f32.mrf.mxu0  ;;  %5759 = vst [vmem:[#allocation10_spill] sm:$0xff] %v4680_v18 }
  0xb5   : > { %3740 = vmatmul.msk.bf16.gmra.mxu1 %vm559_vm2, %v4537_v27  ;;  %v1518_v27 = vrot.slane %v1516_v14, 2 }
  0xb6   : > { %3759 = vmatmul.msk.bf16.gmra.mxu2 %vm559_vm2, %v872_v0  ;;  %v1531_v0 = vshrl.u32 %v4054_v32, 16 }
  0xb7   : > { %3865 = vmatmul.msk.bf16.gmra.mxu0 %vm559_vm2, %v1511_v3  ;;  %v1519_v15 = vor.u32 %v1518_v27, %v1515_v21  ;;  %v877_v27 = vrot.slane %v4520_v5, 1 }
  0xb8   : > { %3848 = vmatmul.msk.bf16.gmra.mxu3 %vm559_vm2, %v1237_v19  ;;  %v1533_v21 = vrot.slane %v1531_v0, 1 }
  0xb9   : > { %v4678_v16 = vpop.f32.mrf.mxu2  ;;  %v1520_v13 = vsel %vm1458_vm4, %v1510_v58, %v1519_v15  ;;  %v1240_v58 = vrot.slane %v4055_v55, 1 }
  0xba   : > { %v4682_v12 = vpop.f32.mrf.mxu1 }
  0xbb   : > { %v4691_v26 = vpop.f32.mrf.mxu3  ;;  %v1241_v14 = vsel %vm861_vm3, %v1238_v34, %v1240_v58 }
  0xbc   : > { %v4685_v20 = vpop.f32.mrf.mxu0  ;;  %5760 = vst [vmem:[#allocation11_spill] sm:$0xff] %v4691_v26 }
  0xc1   : > { %v4689_v25 = vpop.f32.mrf.mxu2 }
  0xc2   : > { %v4693_v28 = vpop.f32.mrf.mxu1 }
  0xc3   : > { %v4706_v41 = vpop.f32.mrf.mxu3 }
  0xc4   : > { %v4697_v33 = vpop.f32.mrf.mxu0  ;;  %5761 = vst [vmem:[#allocation12_spill] sm:$0xff] %v4706_v41 }
  0xc5   : > { %3741 = vmatmul.msk.bf16.gmra.mxu1 %vm559_vm2, %v4441_v8  ;;  %v1527_v8 = vrot.slane %v1525_v36, 2 }
  0xc6   : > { %3760 = vmatmul.msk.bf16.gmra.mxu2 %vm559_vm2, %v874_v30 }
  0xc7   : > { %3866 = vmatmul.msk.bf16.gmra.mxu0 %vm559_vm2, %v1520_v13  ;;  %v1528_v49 = vor.u32 %v1527_v8, %v1524_v42  ;;  %v878_v13 = vsel %vm861_vm3, %v875_v47, %v877_v27  ;;  %v1540_v42 = vshrl.u32 %v4055_v55, 16  ;;  %v1543_v8 = vshll.u32 %v4055_v55, 16 }
  0xc8   : > { %3849 = vmatmul.msk.bf16.gmra.mxu3 %vm559_vm2, %v1239_v24  ;;  %v1242_v24 = vrot.slane %v4056_v35, 1 }
  0xc9   : > { %v4704_v39 = vpop.f32.mrf.mxu2  ;;  %v1529_v17 = vsel %vm1458_vm4, %v1519_v15, %v1528_v49 }
  0xca   : > { %v4708_v44 = vpop.f32.mrf.mxu1  ;;  %v1243_v0 = vsel %vm861_vm3, %v1240_v58, %v1242_v24  ;;  %v1244_v58 = vrot.slane %v4057_v22, 1 }
  0xcb   : > { %v4717_v51 = vpop.f32.mrf.mxu3 }
  0xcc   : > { %v4711_v45 = vpop.f32.mrf.mxu0  ;;  %5762 = vst [vmem:[#allocation13_spill] sm:$0xff] %v4717_v51  ;;  %v1245_v26 = vsel %vm861_vm3, %v1242_v24, %v1244_v58  ;;  %v4058_v24 = vld [vmem:[%s4438_s29 + $0x68] sm:$0xff] }
  0xd1   : > { %v4715_v50 = vpop.f32.mrf.mxu2 }
  0xd2   : > { %v4719_v43 = vpop.f32.mrf.mxu1 }
  0xd3   : > { %v4732_v4 = vpop.f32.mrf.mxu3 }
  0xd4   : > { %v4723_v57 = vpop.f32.mrf.mxu0  ;;  %5763 = vst [vmem:[#allocation14_spill] sm:$0xff] %v4732_v4 }
  0xd5   : > { %3742 = vmatmul.msk.bf16.gmra.mxu1 %vm559_vm2, %v4444_v9  ;;  %v1536_v9 = vrot.slane %v1534_v1, 2 }
  0xd6   : > { %3761 = vmatmul.msk.bf16.gmra.mxu2 %vm559_vm2, %v876_v56 }
  0xd7   : > { %3867 = vmatmul.msk.bf16.gmra.mxu0 %vm559_vm2, %v1529_v17  ;;  %v1537_v23 = vor.u32 %v1536_v9, %v1533_v21 }
  0xd8   : > { %3850 = vmatmul.msk.bf16.gmra.mxu3 %vm559_vm2, %v1241_v14  ;;  %v1545_v14 = vrot.slane %v1543_v8, 2  ;;  %v1549_v8 = vshrl.u32 %v4056_v35, 16 }
  0xd9   : > { %v4730_v3 = vpop.f32.mrf.mxu2  ;;  %v1538_v34 = vsel %vm1458_vm4, %v1528_v49, %v1537_v23  ;;  %v1542_v49 = vrot.slane %v1540_v42, 1 }
  0xda   : > { %v4734_v7 = vpop.f32.mrf.mxu1  ;;  %v1551_v61 = vrot.slane %v1549_v8, 1 }
  0xdb   : > { %v1326_v30 = vpop.f32.mrf.mxu3  ;;  %v1546_v21 = vor.u32 %v1545_v14, %v1542_v49 }
  0xdc   : > { %v4737_v19 = vpop.f32.mrf.mxu0 }
  0xdd   : > { %v1547_v51 = vsel %vm1458_vm4, %v1537_v23, %v1546_v21 }
  0xe1   : > { %v4741_v15 = vpop.f32.mrf.mxu2 }
  0xe2   : > { %v4743_v32 = vpop.f32.mrf.mxu1 }
  0xe3   : > { %v1328_v17 = vpop.f32.mrf.mxu3 }
  0xe4   : > { %v4747_v36 = vpop.f32.mrf.mxu0 }
  0xe5   : > { %3743 = vmatmul.msk.bf16.gmra.mxu1 %vm559_vm2, %v4483_v37  ;;  %v879_v37 = vrot.slane %v4511_v60, 1 }
  0xe6   : > { %3762 = vmatmul.msk.bf16.gmra.mxu2 %vm559_vm2, %v878_v13 }
  0xe7   : > { %3868 = vmatmul.msk.bf16.gmra.mxu0 %vm559_vm2, %v1538_v34  ;;  %v880_v34 = vsel %vm861_vm3, %v877_v27, %v879_v37 }
  0xe8   : > { %3851 = vmatmul.msk.bf16.gmra.mxu3 %vm559_vm2, %v1243_v0  ;;  %v1552_v0 = vshll.u32 %v4056_v35, 16 }
  0xe9   : > { %v4754_v56 = vpop.f32.mrf.mxu2 }
  0xea   : > { %5764 = vst [vmem:[#allocation15_spill] sm:$0xff] %v4754_v56  ;;  %v4756_v47 = vpop.f32.mrf.mxu1 }
  0xeb   : > { %v1331_v13 = vpop.f32.mrf.mxu3 }
  0xec   : > { %v4759_v1 = vpop.f32.mrf.mxu0 }
  0xf1   : > { %v4763_v9 = vpop.f32.mrf.mxu2 }
  0xf2   : > { %5765 = vst [vmem:[#allocation16_spill] sm:$0xff] %v4763_v9  ;;  %v765_v55 = vpop.f32.mrf.mxu1 }
  0xf3   : > { %v766_v42 = vadd.f32 %v765_v55, %v4647_v48  ;;  %v1333_v14 = vpop.f32.mrf.mxu3 }
  0xf4   : > { %v1695_v4 = vpop.f32.mrf.mxu0 }
  0xf5   : > { %3744 = vmatmul.msk.bf16.gmra.mxu1 %vm559_vm2, %v4520_v5  ;;  %v1554_v5 = vrot.slane %v1552_v0, 2  ;;  %v1561_v0 = vshll.u32 %v4057_v22, 16 }
  0xf6   : > { %3763 = vmatmul.msk.bf16.gmra.mxu2 %vm559_vm2, %v880_v34 }
  0xf7   : > { %3869 = vmatmul.msk.bf16.gmra.mxu0 %vm559_vm2, %v1547_v51  ;;  %v881_v51 = vrot.slane %v4447_v10, 1  ;;  %v1555_v35 = vor.u32 %v1554_v5, %v1551_v61 }
  0xf8   : > { %3852 = vmatmul.msk.bf16.gmra.mxu3 %vm559_vm2, %v1245_v26 }
  0xf9   : > { %v965_v49 = vpop.f32.mrf.mxu2  ;;  %v882_v56 = vsel %vm861_vm3, %v879_v37, %v881_v51  ;;  %v1556_v8 = vsel %vm1458_vm4, %v1546_v21, %v1555_v35 }
  0xfa   : > { %v1055_v41 = vadd.f32 %v965_v49, %v766_v42  ;;  %v767_v27 = vpop.f32.mrf.mxu1 }
  0xfb   : > { %v768_v48 = vadd.f32 %v767_v27, %v4659_v29  ;;  %v1336_v9 = vpop.f32.mrf.mxu3  ;;  %v1246_v29 = vrot.slane %v4058_v24, 1 }
  0xfc   : > { %v1416_v23 = vadd.f32 %v1326_v30, %v1055_v41  ;;  %v1697_v18 = vpop.f32.mrf.mxu0 }
  0xfd   : > { %v1247_v21 = vsel %vm861_vm3, %v1244_v58, %v1246_v29  ;;  %v4059_v58 = vld [vmem:[%s4438_s29 + $0x70] sm:$0xff] }
  0xfe   : > { %v4775_v34 = vadd.f32 %v1695_v4, %v1416_v23  ;;  %v1558_v4 = vshrl.u32 %v4057_v22, 16 }
 0x101   : > { %v967_v55 = vpop.f32.mrf.mxu2 }
 0x102   : > { %v1056_v42 = vadd.f32 %v967_v55, %v768_v48  ;;  %v770_v49 = vpop.f32.mrf.mxu1  ;;  %v1560_v48 = vrot.slane %v1558_v4, 1  ;;  %v883_v55 = vrot.slane %v4450_v11, 1 }
 0x103   : > { %v771_v61 = vadd.f32 %v770_v49, %v4671_v2  ;;  %v1338_v27 = vpop.f32.mrf.mxu3 }
 0x104   : > { %v1417_v41 = vadd.f32 %v1328_v17, %v1056_v42  ;;  %v1700_v30 = vpop.f32.mrf.mxu0 }
 0x105   : > { %3745 = vmatmul.msk.bf16.gmra.mxu1 %vm559_vm2, %v4511_v60 }
 0x106   : > { %3764 = vmatmul.msk.bf16.gmra.mxu2 %vm559_vm2, %v882_v56  ;;  %v4785_v26 = vadd.f32 %v1697_v18, %v1417_v41  ;;  %v1563_v56 = vrot.slane %v1561_v0, 2 }
 0x107   : > { %3870 = vmatmul.msk.bf16.gmra.mxu0 %vm559_vm2, %v1556_v8 }
 0x108   : > { %3853 = vmatmul.msk.bf16.gmra.mxu3 %vm559_vm2, %v1247_v21  ;;  %v1564_v22 = vor.u32 %v1563_v56, %v1560_v48 }
 0x109   : > { %v970_v37 = vpop.f32.mrf.mxu2 }
 0x10a   : > { %v1057_v17 = vadd.f32 %v970_v37, %v771_v61  ;;  %v772_v23 = vpop.f32.mrf.mxu1  ;;  %v884_v61 = vsel %vm861_vm3, %v881_v51, %v883_v55  ;;  %v1565_v4 = vsel %vm1458_vm4, %v1555_v35, %v1564_v22 }
 0x10b   : > { %v773_v2 = vadd.f32 %v772_v23, %v4685_v20  ;;  %v1341_v49 = vpop.f32.mrf.mxu3  ;;  %v1248_v20 = vrot.slane %v4059_v58, 1  ;;  %v1570_v23 = vshll.u32 %v4058_v24, 16 }
 0x10c   : > { %v1418_v5 = vadd.f32 %v1331_v13, %v1057_v17  ;;  %v1702_v60 = vpop.f32.mrf.mxu0  ;;  %v1567_v17 = vshrl.u32 %v4058_v24, 16 }
 0x10d   : > { %v1249_v35 = vsel %vm861_vm3, %v1246_v29, %v1248_v20  ;;  %v4060_v29 = vld [vmem:[%s4438_s29 + $0x78] sm:$0xff] }
 0x10e   : > { %v4791_v18 = vadd.f32 %v1700_v30, %v1418_v5  ;;  %v1569_v56 = vrot.slane %v1567_v17, 1 }
 0x111   : > { %v972_v42 = vpop.f32.mrf.mxu2 }
 0x112   : > { %v1058_v41 = vadd.f32 %v972_v42, %v773_v2  ;;  %v775_v8 = vpop.f32.mrf.mxu1  ;;  %v1572_v2 = vrot.slane %v1570_v23, 2  ;;  %v885_v42 = vrot.slane %v4487_v38, 1 }
 0x113   : > { %v776_v0 = vadd.f32 %v775_v8, %v4697_v33  ;;  %v1343_v21 = vpop.f32.mrf.mxu3 }
 0x114   : > { %v1419_v13 = vadd.f32 %v1333_v14, %v1058_v41  ;;  %v1705_v37 = vpop.f32.mrf.mxu0  ;;  %v1573_v24 = vor.u32 %v1572_v2, %v1569_v56 }
 0x115   : > { %3746 = vmatmul.msk.bf16.gmra.mxu1 %vm559_vm2, %v4447_v10 }
 0x116   : > { %3765 = vmatmul.msk.bf16.gmra.mxu2 %vm559_vm2, %v884_v61  ;;  %v4801_v30 = vadd.f32 %v1702_v60, %v1419_v13  ;;  %v1574_v17 = vsel %vm1458_vm4, %v1564_v22, %v1573_v24 }
 0x117   : > { %3871 = vmatmul.msk.bf16.gmra.mxu0 %vm559_vm2, %v1565_v4  ;;  %v886_v4 = vsel %vm861_vm3, %v883_v55, %v885_v42 }
 0x118   : > { %3854 = vmatmul.msk.bf16.gmra.mxu3 %vm559_vm2, %v1249_v35 }
 0x119   : > { %v975_v51 = vpop.f32.mrf.mxu2 }
 0x11a   : > { %v1059_v14 = vadd.f32 %v975_v51, %v776_v0  ;;  %v777_v5 = vpop.f32.mrf.mxu1  ;;  %v1576_v51 = vshrl.u32 %v4059_v58, 16 }
 0x11b   : > { %v778_v33 = vadd.f32 %v777_v5, %v4711_v45  ;;  %v1346_v8 = vpop.f32.mrf.mxu3  ;;  %v1250_v45 = vrot.slane %v4060_v29, 1 }
 0x11c   : > { %v1420_v48 = vadd.f32 %v1336_v9, %v1059_v14  ;;  %v1707_v10 = vpop.f32.mrf.mxu0  ;;  %v1579_v14 = vshll.u32 %v4059_v58, 16  ;;  %v1578_v56 = vrot.slane %v1576_v51, 1 }
 0x11d   : > { %v1251_v22 = vsel %vm861_vm3, %v1248_v20, %v1250_v45  ;;  %v4061_v20 = vld [vmem:[%s4438_s29 + $0x80] sm:$0xff] }
 0x11e   : > { %v4807_v60 = vadd.f32 %v1705_v37, %v1420_v48  ;;  %v1581_v2 = vrot.slane %v1579_v14, 2  ;;  %v1585_v14 = vshrl.u32 %v4060_v29, 16 }
 0x120   : > { %v1582_v58 = vor.u32 %v1581_v2, %v1578_v56  ;;  %v889_v2 = vrot.slane %v4558_v52, 1 }
 0x121   : > { %v977_v41 = vpop.f32.mrf.mxu2 }
 0x122   : > { %v1060_v61 = vadd.f32 %v977_v41, %v778_v33  ;;  %v780_v13 = vpop.f32.mrf.mxu1  ;;  %v887_v33 = vrot.slane %v4523_v6, 1 }
 0x123   : > { %v781_v23 = vadd.f32 %v780_v13, %v4723_v57  ;;  %v1348_v5 = vpop.f32.mrf.mxu3 }
 0x124   : > { %v1421_v9 = vadd.f32 %v1338_v27, %v1060_v61  ;;  %v1710_v0 = vpop.f32.mrf.mxu0 }
 0x125   : > { %3747 = vmatmul.msk.bf16.gmra.mxu1 %vm559_vm2, %v4450_v11 }
 0x126   : > { %3766 = vmatmul.msk.bf16.gmra.mxu2 %vm559_vm2, %v886_v4  ;;  %v4817_v37 = vadd.f32 %v1707_v10, %v1421_v9  ;;  %v888_v9 = vsel %vm861_vm3, %v885_v42, %v887_v33 }
 0x127   : > { %3872 = vmatmul.msk.bf16.gmra.mxu0 %vm559_vm2, %v1574_v17 }
 0x128   : > { %3855 = vmatmul.msk.bf16.gmra.mxu3 %vm559_vm2, %v1251_v22 }
 0x129   : > { %v980_v55 = vpop.f32.mrf.mxu2 }
 0x12a   : > { %v1061_v27 = vadd.f32 %v980_v55, %v781_v23  ;;  %v782_v35 = vpop.f32.mrf.mxu1  ;;  %v1583_v23 = vsel %vm1458_vm4, %v1573_v24, %v1582_v58  ;;  %v1588_v55 = vshll.u32 %v4060_v29, 16 }
 0x12b   : > { %v783_v57 = vadd.f32 %v782_v35, %v4737_v19  ;;  %v1351_v61 = vpop.f32.mrf.mxu3  ;;  %v1252_v19 = vrot.slane %v4061_v20, 1 }
 0x12c   : > { %v1422_v48 = vadd.f32 %v1341_v49, %v1061_v27  ;;  %v1712_v11 = vpop.f32.mrf.mxu0  ;;  %v1590_v56 = vrot.slane %v1588_v55, 2  ;;  %v1597_v55 = vshll.u32 %v4061_v20, 16 }
 0x12d   : > { %v1253_v24 = vsel %vm861_vm3, %v1250_v45, %v1252_v19  ;;  %v4062_v45 = vld [vmem:[%s4438_s29 + $0x88] sm:$0xff] }
 0x12e   : > { %v4823_v10 = vadd.f32 %v1710_v0, %v1422_v48  ;;  %v1587_v48 = vrot.slane %v1585_v14, 1  ;;  %v1594_v14 = vshrl.u32 %v4061_v20, 16 }
 0x130   : > { %v1591_v29 = vor.u32 %v1590_v56, %v1587_v48  ;;  %v891_v48 = vrot.slane %v4474_v31, 1 }
 0x131   : > { %v982_v41 = vpop.f32.mrf.mxu2 }
 0x132   : > { %v1062_v13 = vadd.f32 %v982_v41, %v783_v57  ;;  %v785_v4 = vpop.f32.mrf.mxu1 }
 0x133   : > { %v786_v51 = vadd.f32 %v785_v4, %v4747_v36  ;;  %v1353_v27 = vpop.f32.mrf.mxu3 }
 0x134   : > { %v1423_v49 = vadd.f32 %v1343_v21, %v1062_v13  ;;  %v1715_v17 = vpop.f32.mrf.mxu0 }
 0x135   : > { %3748 = vmatmul.msk.bf16.gmra.mxu1 %vm559_vm2, %v4487_v38 }
 0x136   : > { %3767 = vmatmul.msk.bf16.gmra.mxu2 %vm559_vm2, %v888_v9  ;;  %v4833_v0 = vadd.f32 %v1712_v11, %v1423_v49  ;;  %v890_v9 = vsel %vm861_vm3, %v887_v33, %v889_v2 }
 0x137   : > { %3873 = vmatmul.msk.bf16.gmra.mxu0 %vm559_vm2, %v1583_v23  ;;  %v1592_v23 = vsel %vm1458_vm4, %v1582_v58, %v1591_v29 }
 0x138   : > { %3856 = vmatmul.msk.bf16.gmra.mxu3 %vm559_vm2, %v1253_v24  ;;  %v1596_v24 = vrot.slane %v1594_v14, 1 }
 0x139   : > { %v985_v42 = vpop.f32.mrf.mxu2 }
 0x13a   : > { %v1063_v21 = vadd.f32 %v985_v42, %v786_v51  ;;  %v787_v35 = vpop.f32.mrf.mxu1 }
 0x13b   : > { %v788_v36 = vadd.f32 %v787_v35, %v4759_v1  ;;  %v1356_v41 = vpop.f32.mrf.mxu3  ;;  %v1254_v1 = vrot.slane %v4062_v45, 1 }
 0x13c   : > { %v1424_v22 = vadd.f32 %v1346_v8, %v1063_v21  ;;  %v1717_v38 = vpop.f32.mrf.mxu0 }
 0x13d   : > { %v1255_v58 = vsel %vm861_vm3, %v1252_v19, %v1254_v1  ;;  %v4063_v19 = vld [vmem:[%s4438_s29 + $0x90] sm:$0xff] }
 0x13e   : > { %v4839_v11 = vadd.f32 %v1715_v17, %v1424_v22  ;;  %v1599_v22 = vrot.slane %v1597_v55, 2 }
 0x140   : > { %v1600_v20 = vor.u32 %v1599_v22, %v1596_v24 }
 0x141   : > { %v987_v57 = vpop.f32.mrf.mxu2 }
 0x142   : > { %v1064_v13 = vadd.f32 %v987_v57, %v788_v36  ;;  %v790_v4 = vpop.f32.mrf.mxu1 }
 0x143   : > { %v791_v51 = vadd.f32 %v790_v4, %v4643_v46  ;;  %v1358_v42 = vpop.f32.mrf.mxu3  ;;  %v892_v4 = vsel %vm861_vm3, %v889_v2, %v891_v48  ;;  %v1603_v2 = vshrl.u32 %v4062_v45, 16 }
 0x144   : > { %v1425_v8 = vadd.f32 %v1348_v5, %v1064_v13  ;;  %v1720_v49 = vpop.f32.mrf.mxu0 }
 0x145   : > { %3749 = vmatmul.msk.bf16.gmra.mxu1 %vm559_vm2, %v4523_v6 }
 0x146   : > { %3768 = vmatmul.msk.bf16.gmra.mxu2 %vm559_vm2, %v890_v9  ;;  %v4849_v17 = vadd.f32 %v1717_v38, %v1425_v8  ;;  %v1601_v8 = vsel %vm1458_vm4, %v1591_v29, %v1600_v20 }
 0x147   : > { %3874 = vmatmul.msk.bf16.gmra.mxu0 %vm559_vm2, %v1592_v23  ;;  %v1606_v23 = vshll.u32 %v4062_v45, 16 }
 0x148   : > { %3857 = vmatmul.msk.bf16.gmra.mxu3 %vm559_vm2, %v1255_v58  ;;  %v1127_v58 = vld [vmem:[%s4438_s29 + $0x98] sm:$0x1] }
 0x149   : > { %v990_v33 = vpop.f32.mrf.mxu2 }
 0x14a   : > { %v1065_v5 = vadd.f32 %v990_v33, %v791_v51  ;;  %v792_v21 = vpop.f32.mrf.mxu1 }
 0x14b   : > { %v793_v46 = vadd.f32 %v792_v21, %v4656_v54  ;;  %v1361_v36 = vpop.f32.mrf.mxu3  ;;  %v1256_v54 = vrot.slane %v4063_v19, 1  ;;  %v1608_v21 = vrot.slane %v1606_v23, 2 }
 0x14c   : > { %v1426_v35 = vadd.f32 %v1351_v61, %v1065_v5  ;;  %v1722_v6 = vpop.f32.mrf.mxu0  ;;  %v1605_v5 = vrot.slane %v1603_v2, 1  ;;  %v4166_v2 = vld [vmem:[%s4438_s29 + $0x78] sm:$0xff] }
 0x14e   : > { %v4855_v38 = vadd.f32 %v1720_v49, %v1426_v35 }
 0x151   : > { %v992_v56 = vpop.f32.mrf.mxu2 }
 0x152   : > { %v1066_v57 = vadd.f32 %v992_v56, %v793_v46  ;;  %v795_v13 = vpop.f32.mrf.mxu1 }
 0x153   : > { %v796_v49 = vadd.f32 %v795_v13, %v4667_v62  ;;  %v4869_v51 = vpop.f32.mrf.mxu3  ;;  %v4877_v62 = vld [vmem:[%s4438_s29 + $0x80] sm:$0xff] }
 0x154   : > { %v1427_v61 = vadd.f32 %v1353_v27, %v1066_v57  ;;  %v1725_v9 = vpop.f32.mrf.mxu0  ;;  %v893_v45 = vrot.slane %v4877_v62, 1 }
 0x155   : > { %3750 = vmatmul.msk.bf16.gmra.mxu1 %vm559_vm2, %v4558_v52  ;;  %v1257_v52 = vsel %vm861_vm3, %v1254_v1, %v1256_v54  ;;  %v1609_v1 = vor.u32 %v1608_v21, %v1605_v5  ;;  %v4901_v21 = vld [vmem:[%s4438_s29 + $0x18] sm:$0xff] }
 0x156   : > { %3769 = vmatmul.msk.bf16.gmra.mxu2 %vm559_vm2, %v892_v4  ;;  %v4865_v31 = vadd.f32 %v1722_v6, %v1427_v61  ;;  %v1203_v6 = vunpack.c.l.b16 %v1127_v58  ;;  %v894_v57 = vsel %vm861_vm3, %v891_v48, %v893_v45 }
 0x157   : > { %3875 = vmatmul.msk.bf16.gmra.mxu0 %vm559_vm2, %v1601_v8  ;;  %v2057_v8 = vld [vmem:[%s4438_s29 + $0x10] sm:$0xc] }
 0x158   : > { %3858 = vmatmul.msk.bf16.gmra.mxu3 %vm559_vm2, %v1257_v52  ;;  %v1222_v13 = vpack.c.b16 %v1203_v6, %v1203_v6  ;;  %v2133_v48 = vunpack.c.l.b16 %v2057_v8 }
 0x159   : > { %v995_v27 = vpop.f32.mrf.mxu2 }
 0x15a   : > { %v1067_v29 = vadd.f32 %v995_v27, %v796_v49  ;;  %v797_v14 = vpop.f32.mrf.mxu1  ;;  %v4887_v49 = vld [vmem:[%s4438_s29 + $0x14] sm:$0xf]  ;;  %v1258_v23 = vrot.slane %v1222_v13, 1  ;;  %v1612_v27 = vshrl.u32 %v4063_v19, 16 }
 0x15b   : > { %v798_v24 = vadd.f32 %v797_v14, %v4682_v12  ;;  %v4881_v22 = vpop.f32.mrf.mxu3 }
 0x15c   : > { %v1428_v55 = vadd.f32 %v1356_v41, %v1067_v29  ;;  %v1727_v33 = vpop.f32.mrf.mxu0  ;;  %v1615_v29 = vshll.u32 %v4063_v19, 16 }
 0x15e   : > { %v4874_v35 = vadd.f32 %v1725_v9, %v1428_v55  ;;  %v1610_v9 = vsel %vm1458_vm4, %v1600_v20, %v1609_v1 }
 0x161   : > { %v997_v41 = vpop.f32.mrf.mxu2 }
 0x162   : > { %v1068_v46 = vadd.f32 %v997_v41, %v798_v24  ;;  %v800_v56 = vpop.f32.mrf.mxu1  ;;  %v1614_v41 = vrot.slane %v1612_v27, 1 }
 0x163   : > { %v801_v20 = vadd.f32 %v800_v56, %v4693_v28  ;;  %v4897_v52 = vpop.f32.mrf.mxu3  ;;  %v1452_v28 = vld [vmem:[%s4438_s29 + $0x98] sm:$0x3]  ;;  %v4909_v56 = vld [vmem:[%s4438_s29 + $0x88] sm:$0xff] }
 0x164   : > { %v1429_v4 = vadd.f32 %v1358_v42, %v1068_v46  ;;  %v1730_v61 = vpop.f32.mrf.mxu0  ;;  %v5754_v42 = vunpack.c.l.b16 %v4887_v49  ;;  %v1617_v46 = vrot.slane %v1615_v29, 2  ;;  %v895_v19 = vrot.slane %v4909_v56, 1 }
 0x165   : > { %3751 = vmatmul.msk.bf16.gmra.mxu1 %vm559_vm2, %v4166_v2  ;;  %v1456_v2 = vunpack.c.l.b16 %v1452_v28 }
 0x166   : > { %3770 = vmatmul.msk.bf16.gmra.mxu2 %vm559_vm2, %v894_v57  ;;  %v4892_v12 = vadd.f32 %v1727_v33, %v1429_v4  ;;  %v1259_v33 = vsel %vm861_vm3, %v1256_v54, %v1258_v23  ;;  %v4905_v58 = vpack.c.b16 %v5754_v42, %v2133_v48  ;;  %v2434_v4 = vshrl.u32 %v4901_v21, 16 }
 0x167   : > { %3876 = vmatmul.msk.bf16.gmra.mxu0 %vm559_vm2, %v1610_v9  ;;  %v1618_v8 = vor.u32 %v1617_v46, %v1614_v41  ;;  %v896_v27 = vsel %vm861_vm3, %v893_v45, %v895_v19 }
 0x168   : > { %5766 = vst [vmem:[#allocation17_spill] sm:$0xff] %v4892_v12  ;;  %3859 = vmatmul.msk.bf16.gmra.mxu3 %vm559_vm2, %v1259_v33  ;;  %v2426_v54 = vshrl.u32 %v4905_v58, 16  ;;  %v2429_v13 = vshll.u32 %v4905_v58, 16  ;;  %v4925_v12 = vpack.c.b16 %v1456_v2, %v1456_v2  ;;  %v897_v2 = vrot.slane %v4547_v40, 1 }
 0x169   : > { %v1000_v14 = vpop.f32.mrf.mxu2 }
 0x16a   : > { %v1069_v55 = vadd.f32 %v1000_v14, %v801_v20  ;;  %v802_v5 = vpop.f32.mrf.mxu1  ;;  %v2428_v29 = vrot.slane %v2426_v54, 2  ;;  %v2431_v14 = vrot.slane %v2429_v13, 3 }
 0x16b   : > { %v803_v9 = vadd.f32 %v802_v5, %v4708_v44  ;;  %v4920_v48 = vpop.f32.mrf.mxu3 }
 0x16c   : > { %v1430_v6 = vadd.f32 %v1361_v36, %v1069_v55  ;;  %v1732_v24 = vpop.f32.mrf.mxu0  ;;  %v2437_v36 = vshll.u32 %v4901_v21, 16  ;;  %v2436_v55 = vrot.slane %v2434_v4, 2  ;;  %v2432_v45 = vor.u32 %v2431_v14, %v2428_v29 }
 0x16e   : > { %v4913_v57 = vadd.f32 %v1730_v61, %v1430_v6  ;;  %v2439_v33 = vrot.slane %v2437_v36, 3 }
 0x170   : > { %5767 = vst [vmem:[#allocation18_spill] sm:$0xff] %v4913_v57  ;;  %v1619_v57 = vsel %vm1458_vm4, %v1609_v1, %v1618_v8  ;;  %v2440_v5 = vor.u32 %v2439_v33, %v2436_v55  ;;  %v1624_v1 = vshll.u32 %v4925_v12, 16  ;;  %v898_v33 = vsel %vm861_vm3, %v895_v19, %v897_v2  ;;  %v4970_v2 = vld [vmem:[%s4438_s29 + $0x28] sm:$0xff] }
 0x171   : > { %v1002_v23 = vpop.f32.mrf.mxu2 }
 0x172   : > { %v1070_v20 = vadd.f32 %v1002_v23, %v803_v9  ;;  %v805_v61 = vpop.f32.mrf.mxu1  ;;  %v2441_v13 = vsel %vm2424_vm5, %v2432_v45, %v2440_v5 }
 0x173   : > { %v806_v41 = vadd.f32 %v805_v61, %v4719_v43  ;;  %v4936_v28 = vpop.f32.mrf.mxu3  ;;  %v1626_v43 = vrot.slane %v1624_v1, 2  ;;  %v2787_v1 = vld [vmem:[%s4438_s29 + $0x10] sm:$0x8] }
 0x174   : > { %v1431_v6 = vadd.f32 %v4869_v51, %v1070_v20  ;;  %v1735_v42 = vpop.f32.mrf.mxu0  ;;  %v1621_v51 = vshrl.u32 %v4925_v12, 16 }
 0x175   : > { %3752 = vmatmul.msk.bf16.gmra.mxu1 %vm559_vm2, %v4877_v62 }
 0x176   : > { %3771 = vmatmul.msk.bf16.gmra.mxu2 %vm559_vm2, %v896_v27  ;;  %v4930_v44 = vadd.f32 %v1732_v24, %v1431_v6  ;;  %v4940_v24 = vld [vmem:[%s4438_s29 + $0x20] sm:$0xff]  ;;  %v1623_v36 = vrot.slane %v1621_v51, 1  ;;  %v1821_v6 = vld [vmem:[%s4438_s29 + $0x8] sm:$0xc] }
 0x177   : > { %3877 = vmatmul.msk.bf16.gmra.mxu0 %vm559_vm2, %v1619_v57  ;;  %v2443_v23 = vshrl.u32 %v4940_v24, 16  ;;  %v2446_v20 = vshll.u32 %v4940_v24, 16 }
 0x178   : > { %3986 = vmatmul.msk.bf16.vlgmr.msra.gmra.mxu3 %vm559_vm2, %v2441_v13  ;;  %v1627_v61 = vor.u32 %v1626_v43, %v1623_v36 }
 0x179   : > { %v1005_v46 = vpop.f32.mrf.mxu2  ;;  %v2448_v45 = vrot.slane %v2446_v20, 3  ;;  %v5769_v20 = vunpack.c.l.b16 %v4887_v49  ;;  %v2190_v49 = vrot.slane %v4901_v21, 2 }
 0x17a   : > { %v1071_v54 = vadd.f32 %v1005_v46, %v806_v41  ;;  %v807_v62 = vpop.f32.mrf.mxu1  ;;  %v1628_v51 = vsel %vm1458_vm4, %v1618_v8, %v1627_v61  ;;  %v3059_v61 = vld [vmem:[%s5749_s2] sm:$0xff] }
 0x17b   : > { %v808_v27 = vadd.f32 %v807_v62, %v4734_v7  ;;  %v1825_v7 = vunpack.c.l.b16 %v1821_v6  ;;  %v2791_v62 = vunpack.c.l.b16 %v2787_v1 }
 0x17c   : > { %v1432_v57 = vadd.f32 %v4881_v22, %v1071_v54  ;;  %v1737_v4 = vpop.f32.mrf.mxu0  ;;  %v4950_v22 = vpop.f32.mrf.mxu3 }
 0x17e   : > { %v4944_v9 = vadd.f32 %v1735_v42, %v1432_v57  ;;  %v2445_v42 = vrot.slane %v2443_v23, 2  ;;  %v5768_v57 = vunpack.c.l.b16 %v4569_v63 }
 0x180   : > { %v2449_v19 = vor.u32 %v2448_v45, %v2445_v42  ;;  %v1826_v36 = vpack.c.b16 %v5768_v57, %v1825_v7  ;;  %v2795_v45 = vrot.slane %v4901_v21, 3  ;;  %v3060_v21 = vld [vmem:[%s5749_s2 + $0x8] sm:$0xff] }
 0x181   : > { %v1007_v29 = vpop.f32.mrf.mxu2 }
 0x182   : > { %v1072_v14 = vadd.f32 %v1007_v29, %v808_v27  ;;  %v810_v55 = vpop.f32.mrf.mxu1  ;;  %v2450_v43 = vsel %vm2424_vm5, %v2440_v5, %v2449_v19  ;;  %v4325_v27 = vmov 0   ;;  %v1828_v63 = vrot.slane %v1826_v36, 2  ;;  %v4168_v29 = vld [vmem:[%s4438_s29 + $0x10] sm:$0xff] }
 0x183   : > { %v811_v54 = vadd.f32 %v810_v55, %v4743_v32  ;;  %v2792_v32 = vpack.c.b16 %v5769_v20, %v2791_v62  ;;  %4162 = vset.pattern.permute.xlu0 %v4325_v27  ;;  %4163 = vset.pattern.permute.xlu1 %v4325_v27  ;;  %v1829_v5 = vrot.slane %v4168_v29, 2  ;;  %v2452_v55 = vshrl.u32 %v4970_v2, 16 }
 0x184   : > { %v1433_v40 = vadd.f32 %v4897_v52, %v1072_v14  ;;  %v1740_v41 = vpop.f32.mrf.mxu0  ;;  %v4964_v13 = vpop.f32.mrf.mxu3  ;;  %3097 = vperm.xlu0 %4162, %v3059_v61   ;;  %4164 = vset.pattern.permute.xlu2 %v4325_v27  ;;  %v5003_v27 = vld [vmem:[%s4438_s29 + $0x30] sm:$0xff] }
 0x185   : > { %3753 = vmatmul.msk.bf16.gmra.mxu1 %vm559_vm2, %v4909_v56  ;;  %v2794_v42 = vrot.slane %v2792_v32, 3  ;;  %v1830_v7 = vsel %vm1827_vm6, %v1828_v63, %v1829_v5 }
 0x186   : > { %3772 = vmatmul.msk.bf16.gmra.mxu2 %vm559_vm2, %v898_v33  ;;  %v4960_v46 = vadd.f32 %v1737_v4, %v1433_v40  ;;  %v2455_v33 = vshll.u32 %v4970_v2, 16 }
 0x187   : > { %3878 = vmatmul.msk.bf16.gmra.mxu0 %vm559_vm2, %v1628_v51 }
 0x188   : > { %3987 = vmatmul.msk.bf16.gmra.mxu3 %vm559_vm2, %v2450_v43  ;;  %v2457_v62 = vrot.slane %v2455_v33, 3  ;;  %v2464_v33 = vshll.u32 %v5003_v27, 16 }
 0x189   : > { %v1010_v52 = vpop.f32.mrf.mxu2 }
 0x18a   : > { %v1073_v8 = vadd.f32 %v1010_v52, %v811_v54  ;;  %v812_v56 = vpop.f32.mrf.mxu1  ;;  %v2454_v54 = vrot.slane %v2452_v55, 2  ;;  %v2192_v55 = vrot.slane %v4940_v24, 2 }
 0x18b   : > { %v813_v6 = vadd.f32 %v812_v56, %v4756_v47  ;;  %v2796_v47 = vsel %vm2793_vm7, %v2794_v42, %v2795_v45 }
 0x18c   : > { %v1434_v4 = vadd.f32 %v4920_v48, %v1073_v8  ;;  %v1742_v23 = vpop.f32.mrf.mxu0  ;;  %v2189_v48 = vrot.slane %v4905_v58, 2  ;;  %v1381_v51 = vpop.f32.mrf.mxu3  ;;  %3102 = vperm.xlu0 %4162, %v3060_v21   ;;  %v2458_v36 = vor.u32 %v2457_v62, %v2454_v54  ;;  %v2466_v62 = vrot.slane %v2464_v33, 3 }
 0x18e   : > { %v4980_v14 = vadd.f32 %v1740_v41, %v1434_v4  ;;  %v2191_v58 = vsel %vm1827_vm6, %v2189_v48, %v2190_v49  ;;  %v2459_v32 = vsel %vm2424_vm5, %v2449_v19, %v2458_v36  ;;  %v2461_v19 = vshrl.u32 %v5003_v27, 16 }
 0x190   : > { %v2463_v54 = vrot.slane %v2461_v19, 2 }
 0x191   : > { %v1012_v40 = vpop.f32.mrf.mxu2 }
 0x192   : > { %v1074_v1 = vadd.f32 %v1012_v40, %v813_v6  ;;  %v815_v41 = vpop.f32.mrf.mxu1  ;;  %v2797_v6 = vrot.slane %v4940_v24, 3 }
 0x194   : > { %v1435_v52 = vadd.f32 %v4936_v28, %v1074_v1  ;;  %v1745_v8 = vpop.f32.mrf.mxu0  ;;  %v816_v28 = vadd.f32 %v815_v41, %v4654_v53  ;;  %v1383_v43 = vpop.f32.mrf.mxu3  ;;  %v4169_v53 = vld [vmem:[%s4438_s29 + $0x18] sm:$0xff] }
 0x195   : > { %3880 = vmatmul.msk.bf16.vlgmr.msra.gmra.mxu1 %vm559_vm2, %v1830_v7  ;;  %v1831_v48 = vrot.slane %v4169_v53, 2  ;;  %v2194_v53 = vrot.slane %v4970_v2, 2 }
 0x196   : > { %3967 = vmatmul.msk.bf16.vlgmr.msra.gmra.mxu2 %vm559_vm2, %v2191_v58  ;;  %v4997_v57 = vadd.f32 %v1742_v23, %v1435_v52  ;;  %v3061_v23 = vld [vmem:[%s5749_s2 + $0x10] sm:$0xff]  ;;  %v2193_v58 = vsel %vm1827_vm6, %v2190_v49, %v2192_v55 }
 0x197   : > { %4005 = vmatmul.msk.bf16.vlgmr.msra.gmra.mxu0 %vm559_vm2, %v2796_v47  ;;  %3107 = vperm.xlu1 %4163, %v3061_v23   ;;  %v1832_v7 = vsel %vm1827_vm6, %v1829_v5, %v1831_v48  ;;  %v2798_v47 = vsel %vm2793_vm7, %v2795_v45, %v2797_v6  ;;  %v2467_v5 = vor.u32 %v2466_v62, %v2463_v54 }
 0x198   : > { %3988 = vmatmul.msk.bf16.gmra.mxu3 %vm559_vm2, %v2459_v32 }
 0x199   : > { %v1015_v56 = vpop.f32.mrf.mxu2 }
 0x19a   : > { %v1075_v4 = vadd.f32 %v1015_v56, %v816_v28  ;;  %v817_v20 = vpop.f32.mrf.mxu1  ;;  %v2468_v56 = vsel %vm2424_vm5, %v2458_v36, %v2467_v5  ;;  %v2799_v36 = vrot.slane %v4970_v2, 3 }
 0x19c   : > { %v1436_v61 = vadd.f32 %v4950_v22, %v1075_v4  ;;  %v1747_v63 = vpop.f32.mrf.mxu0  ;;  %v818_v22 = vadd.f32 %v817_v20, %v4663_v59  ;;  %v1386_v40 = vpop.f32.mrf.mxu3  ;;  %v3062_v59 = vld [vmem:[%s5749_s2 + $0x18] sm:$0xff] }
 0x19d   : > { %v5033_v4 = vld [vmem:[%s4438_s29 + $0x38] sm:$0xff] }
 0x19e   : > { %v5010_v29 = vadd.f32 %v1745_v8, %v1436_v61  ;;  %v2473_v19 = vshll.u32 %v5033_v4, 16 }
 0x19f   : > { %3112 = vperm.xlu1 %4163, %v3062_v59  }
 0x1a0   : > { %v2475_v54 = vrot.slane %v2473_v19, 3 }
 0x1a1   : > { %v1017_v42 = vpop.f32.mrf.mxu2 }
 0x1a2   : > { %v1076_v1 = vadd.f32 %v1017_v42, %v818_v22  ;;  %v820_v41 = vpop.f32.mrf.mxu1 }
 0x1a4   : > { %v1437_v52 = vadd.f32 %v4964_v13, %v1076_v1  ;;  %v1750_v8 = vpop.f32.mrf.mxu0  ;;  %v821_v13 = vadd.f32 %v820_v41, %v4678_v16  ;;  %v1388_v21 = vpop.f32.mrf.mxu3  ;;  %v2470_v16 = vshrl.u32 %v5033_v4, 16 }
 0x1a5   : > { %3881 = vmatmul.msk.bf16.gmra.mxu1 %vm559_vm2, %v1832_v7  ;;  %v2195_v7 = vsel %vm1827_vm6, %v2192_v55, %v2194_v53 }
 0x1a6   : > { %3968 = vmatmul.msk.bf16.gmra.mxu2 %vm559_vm2, %v2193_v58  ;;  %v5027_v24 = vadd.f32 %v1747_v63, %v1437_v52  ;;  %v4170_v63 = vld [vmem:[%s4438_s29 + $0x20] sm:$0xff]  ;;  %v2472_v58 = vrot.slane %v2470_v16, 2  ;;  %v2801_v16 = vrot.slane %v5003_v27, 3 }
 0x1a7   : > { %4006 = vmatmul.msk.bf16.gmra.mxu0 %vm559_vm2, %v2798_v47  ;;  %v1833_v23 = vrot.slane %v4170_v63, 2 }
 0x1a8   : > { %3989 = vmatmul.msk.bf16.gmra.mxu3 %vm559_vm2, %v2468_v56  ;;  %v2476_v2 = vor.u32 %v2475_v54, %v2472_v58 }
 0x1a9   : > { %v1020_v49 = vpop.f32.mrf.mxu2  ;;  %v1834_v41 = vsel %vm1827_vm6, %v1831_v48, %v1833_v23 }
 0x1aa   : > { %v1077_v45 = vadd.f32 %v1020_v49, %v821_v13  ;;  %v822_v28 = vpop.f32.mrf.mxu1  ;;  %v2477_v13 = vsel %vm2424_vm5, %v2467_v5, %v2476_v2 }
 0x1ab   : > { %v823_v33 = vadd.f32 %v822_v28, %v4689_v25  ;;  %v3065_v28 = vld [vmem:[%s5749_s2 + $0x30] sm:$0xff] }
 0x1ac   : > { %v1438_v20 = vadd.f32 %v1381_v51, %v1077_v45  ;;  %v1752_v32 = vpop.f32.mrf.mxu0  ;;  %v1391_v42 = vpop.f32.mrf.mxu3  ;;  %3127 = vperm.xlu0 %4162, %v3065_v28  }
 0x1ae   : > { %v5036_v61 = vadd.f32 %v1750_v8, %v1438_v20  ;;  %v2800_v8 = vsel %vm2793_vm7, %v2797_v6, %v2799_v36  ;;  %v5057_v6 = vld [vmem:[%s4438_s29 + $0x40] sm:$0xff] }
 0x1af   : > { %v2479_v63 = vshrl.u32 %v5057_v6, 16  ;;  %v2482_v5 = vshll.u32 %v5057_v6, 16 }
 0x1b1   : > { %v1022_v22 = vpop.f32.mrf.mxu2  ;;  %v2484_v58 = vrot.slane %v2482_v5, 3 }
 0x1b2   : > { %v1078_v51 = vadd.f32 %v1022_v22, %v823_v33  ;;  %v825_v1 = vpop.f32.mrf.mxu1 }
 0x1b3   : > { %v826_v48 = vadd.f32 %v825_v1, %v4704_v39  ;;  %v4171_v39 = vld [vmem:[%s4438_s29 + $0x28] sm:$0xff] }
 0x1b4   : > { %v1439_v62 = vadd.f32 %v1383_v43, %v1078_v51  ;;  %v1755_v52 = vpop.f32.mrf.mxu0  ;;  %v5053_v47 = vpop.f32.mrf.mxu3  ;;  %v1835_v20 = vrot.slane %v4171_v39, 2 }
 0x1b5   : > { %3882 = vmatmul.msk.bf16.gmra.mxu1 %vm559_vm2, %v1834_v41 }
 0x1b6   : > { %3969 = vmatmul.msk.bf16.gmra.mxu2 %vm559_vm2, %v2195_v7  ;;  %v5049_v25 = vadd.f32 %v1752_v32, %v1439_v62  ;;  %v2196_v32 = vrot.slane %v5003_v27, 2  ;;  %v1836_v1 = vsel %vm1827_vm6, %v1833_v23, %v1835_v20  ;;  %v2481_v7 = vrot.slane %v2479_v63, 2  ;;  %v3066_v27 = vld [vmem:[%s5749_s2 + $0x38] sm:$0xff] }
 0x1b7   : > { %4007 = vmatmul.msk.bf16.gmra.mxu0 %vm559_vm2, %v2800_v8  ;;  %3132 = vperm.xlu1 %4163, %v3066_v27   ;;  %v2198_v63 = vrot.slane %v5033_v4, 2 }
 0x1b8   : > { %3990 = vmatmul.msk.bf16.gmra.mxu3 %vm559_vm2, %v2477_v13  ;;  %v2197_v41 = vsel %vm1827_vm6, %v2194_v53, %v2196_v32 }
 0x1b9   : > { %v1025_v55 = vpop.f32.mrf.mxu2 }
 0x1ba   : > { %v1079_v59 = vadd.f32 %v1025_v55, %v826_v48  ;;  %v827_v43 = vpop.f32.mrf.mxu1 }
 0x1bc   : > { %v1440_v49 = vadd.f32 %v1386_v40, %v1079_v59  ;;  %v1757_v45 = vpop.f32.mrf.mxu0  ;;  %v828_v40 = vadd.f32 %v827_v43, %v4715_v50  ;;  %v5071_v33 = vpop.f32.mrf.mxu3  ;;  %v3063_v50 = vld [vmem:[%s5749_s2 + $0x20] sm:$0xff]  ;;  %v5092_v43 = vld [vmem:[%s4438_s29 + $0x48] sm:$0xff] }
 0x1bd   : > { %3117 = vperm.xlu2 %4164, %v3063_v50   ;;  %v2488_v5 = vshrl.u32 %v5092_v43, 16 }
 0x1be   : > { %v5063_v56 = vadd.f32 %v1755_v52, %v1440_v49  ;;  %v2802_v52 = vsel %vm2793_vm7, %v2799_v36, %v2801_v16 }
 0x1c1   : > { %v1027_v19 = vpop.f32.mrf.mxu2 }
 0x1c2   : > { %v1080_v22 = vadd.f32 %v1027_v19, %v828_v40  ;;  %v830_v51 = vpop.f32.mrf.mxu1  ;;  %v2803_v40 = vrot.slane %v5033_v4, 3 }
 0x1c3   : > { %v831_v53 = vadd.f32 %v830_v51, %v4730_v3  ;;  %v4172_v3 = vld [vmem:[%s4438_s29 + $0x30] sm:$0xff] }
 0x1c4   : > { %v1441_v54 = vadd.f32 %v1388_v21, %v1080_v22  ;;  %v1760_v62 = vpop.f32.mrf.mxu0  ;;  %v2485_v21 = vor.u32 %v2484_v58, %v2481_v7  ;;  %v5088_v8 = vpop.f32.mrf.mxu3  ;;  %v1837_v39 = vrot.slane %v4172_v3, 2  ;;  %v2199_v7 = vsel %vm1827_vm6, %v2196_v32, %v2198_v63  ;;  %v4173_v3 = vld [vmem:[%s4438_s29 + $0x38] sm:$0xff] }
 0x1c5   : > { %3883 = vmatmul.msk.bf16.gmra.mxu1 %vm559_vm2, %v1836_v1  ;;  %v2490_v58 = vrot.slane %v2488_v5, 2  ;;  %v2804_v50 = vsel %vm2793_vm7, %v2801_v16, %v2803_v40  ;;  %v1839_v5 = vrot.slane %v4173_v3, 2 }
 0x1c6   : > { %3970 = vmatmul.msk.bf16.gmra.mxu2 %vm559_vm2, %v2197_v41  ;;  %v5084_v23 = vadd.f32 %v1757_v45, %v1441_v54  ;;  %v2486_v59 = vsel %vm2424_vm5, %v2476_v2, %v2485_v21  ;;  %v3064_v45 = vld [vmem:[%s5749_s2 + $0x28] sm:$0xff]  ;;  %v2491_v2 = vshll.u32 %v5092_v43, 16  ;;  %v1838_v41 = vsel %vm1827_vm6, %v1835_v20, %v1837_v39 }
 0x1c7   : > { %4008 = vmatmul.msk.bf16.gmra.mxu0 %vm559_vm2, %v2802_v52  ;;  %3122 = vperm.xlu2 %4164, %v3064_v45  }
 0x1c8   : > { %3991 = vmatmul.msk.bf16.gmra.mxu3 %vm559_vm2, %v2486_v59  ;;  %v2493_v54 = vrot.slane %v2491_v2, 3  ;;  %v2200_v2 = vrot.slane %v5057_v6, 2 }
 0x1c9   : > { %v1030_v36 = vpop.f32.mrf.mxu2 }
 0x1ca   : > { %v1081_v48 = vadd.f32 %v1030_v36, %v831_v53  ;;  %v832_v55 = vpop.f32.mrf.mxu1  ;;  %v2494_v20 = vor.u32 %v2493_v54, %v2490_v58  ;;  %v1840_v54 = vsel %vm1827_vm6, %v1837_v39, %v1839_v5 }
 0x1cc   : > { %v1442_v13 = vadd.f32 %v1391_v42, %v1081_v48  ;;  %v1762_v49 = vpop.f32.mrf.mxu0  ;;  %v833_v42 = vadd.f32 %v832_v55, %v4741_v15  ;;  %v1401_v22 = vpop.f32.mrf.mxu3  ;;  %v3068_v15 = vld [vmem:[%s5749_s2 + $0x48] sm:$0xff]  ;;  %v2495_v48 = vsel %vm2424_vm5, %v2485_v21, %v2494_v20  ;;  %v5123_v55 = vld [vmem:[%s4438_s29 + $0x50] sm:$0xff] }
 0x1cd   : > { %3142 = vperm.xlu0 %4162, %v3068_v15   ;;  %v2497_v21 = vshrl.u32 %v5123_v55, 16 }
 0x1ce   : > { %v5098_v28 = vadd.f32 %v1760_v62, %v1442_v13 }
 0x1d1   : > { %v1032_v19 = vpop.f32.mrf.mxu2 }
 0x1d2   : > { %v1082_v51 = vadd.f32 %v1032_v19, %v833_v42  ;;  %v835_v1 = vpop.f32.mrf.mxu1  ;;  %v2500_v42 = vshll.u32 %v5123_v55, 16  ;;  %v5771_v19 = vld [vmem:[#allocation16_spill] sm:$0xff] }
 0x1d4   : > { %v1443_v62 = vadd.f32 %v5053_v47, %v1082_v51  ;;  %v1765_v52 = vpop.f32.mrf.mxu0  ;;  %v5770_v47 = vld [vmem:[#allocation15_spill] sm:$0xff]  ;;  %v5119_v53 = vpop.f32.mrf.mxu3  ;;  %v2805_v51 = vrot.slane %v5057_v6, 3  ;;  %v3067_v6 = vld [vmem:[%s5749_s2 + $0x40] sm:$0xff] }
 0x1d5   : > { %3884 = vmatmul.msk.bf16.gmra.mxu1 %vm559_vm2, %v1838_v41  ;;  %v836_v32 = vadd.f32 %v835_v1, %v5770_v47  ;;  %3137 = vperm.xlu2 %4164, %v3067_v6  }
 0x1d6   : > { %3971 = vmatmul.msk.bf16.gmra.mxu2 %vm559_vm2, %v2199_v7  ;;  %v5115_v4 = vadd.f32 %v1762_v49, %v1443_v62  ;;  %v3069_v49 = vld [vmem:[%s5749_s2 + $0x50] sm:$0xff]  ;;  %v2201_v62 = vsel %vm1827_vm6, %v2198_v63, %v2200_v2 }
 0x1d7   : > { %4009 = vmatmul.msk.bf16.gmra.mxu0 %vm559_vm2, %v2804_v50  ;;  %3147 = vperm.xlu1 %4163, %v3069_v49   ;;  %v2502_v50 = vrot.slane %v2500_v42, 3  ;;  %v5155_v49 = vld [vmem:[%s4438_s29 + $0x58] sm:$0xff] }
 0x1d8   : > { %3992 = vmatmul.msk.bf16.gmra.mxu3 %vm559_vm2, %v2495_v48 }
 0x1d9   : > { %v1035_v27 = vpop.f32.mrf.mxu2 }
 0x1da   : > { %v1083_v16 = vadd.f32 %v1035_v27, %v836_v32  ;;  %v837_v36 = vpop.f32.mrf.mxu1  ;;  %v2806_v32 = vsel %vm2793_vm7, %v2803_v40, %v2805_v51 }
 0x1dc   : > { %v1444_v59 = vadd.f32 %v5071_v33, %v1083_v16  ;;  %v1767_v13 = vpop.f32.mrf.mxu0  ;;  %v838_v33 = vadd.f32 %v837_v36, %v5771_v19  ;;  %v1406_v41 = vpop.f32.mrf.mxu3  ;;  %v4174_v19 = vld [vmem:[%s4438_s29 + $0x40] sm:$0xff] }
 0x1de   : > { %v5130_v45 = vadd.f32 %v1765_v52, %v1444_v59  ;;  %v2499_v52 = vrot.slane %v2497_v21, 2 }
 0x1e0   : > { %v2503_v63 = vor.u32 %v2502_v50, %v2499_v52 }
 0x1e1   : > { %v1037_v1 = vpop.f32.mrf.mxu2 }
 0x1e2   : > { %v1084_v7 = vadd.f32 %v1037_v1, %v838_v33  ;;  %v840_v58 = vpop.f32.mrf.mxu1  ;;  %v2504_v59 = vsel %vm2424_vm5, %v2494_v20, %v2503_v63  ;;  %v1841_v33 = vrot.slane %v4174_v19, 2  ;;  %v2202_v1 = vrot.slane %v5092_v43, 2 }
 0x1e3   : > { %v2509_v20 = vshll.u32 %v5155_v49, 16 }
 0x1e4   : > { %v1445_v15 = vadd.f32 %v5088_v8, %v1084_v7  ;;  %v1770_v47 = vpop.f32.mrf.mxu0  ;;  %v5772_v8 = vld [vmem:[#allocation9_spill] sm:$0xff]  ;;  %v5151_v36 = vpop.f32.mrf.mxu3  ;;  %v2506_v7 = vshrl.u32 %v5155_v49, 16 }
 0x1e5   : > { %3885 = vmatmul.msk.bf16.gmra.mxu1 %vm559_vm2, %v1840_v54  ;;  %v841_v27 = vadd.f32 %v840_v58, %v5772_v8  ;;  %v5773_v58 = vld [vmem:[#allocation10_spill] sm:$0xff]  ;;  %v2807_v54 = vrot.slane %v5092_v43, 3  ;;  %v2511_v8 = vrot.slane %v2509_v20, 3 }
 0x1e6   : > { %3972 = vmatmul.msk.bf16.gmra.mxu2 %vm559_vm2, %v2201_v62  ;;  %v5147_v39 = vadd.f32 %v1767_v13, %v1445_v15  ;;  %v3071_v13 = vld [vmem:[%s5749_s2 + $0x60] sm:$0xff]  ;;  %v2508_v6 = vrot.slane %v2506_v7, 2  ;;  %v3072_v43 = vld [vmem:[%s5749_s2 + $0x68] sm:$0xff] }
 0x1e7   : > { %4010 = vmatmul.msk.bf16.gmra.mxu0 %vm559_vm2, %v2806_v32  ;;  %3157 = vperm.xlu0 %4162, %v3071_v13   ;;  %v1842_v32 = vsel %vm1827_vm6, %v1839_v5, %v1841_v33  ;;  %v5186_v7 = vld [vmem:[%s4438_s29 + $0x60] sm:$0xff] }
 0x1e8   : > { %3993 = vmatmul.msk.bf16.gmra.mxu3 %vm559_vm2, %v2504_v59  ;;  %3162 = vperm.xlu1 %4163, %v3072_v43  }
 0x1e9   : > { %v1040_v16 = vpop.f32.mrf.mxu2 }
 0x1ea   : > { %v1085_v40 = vadd.f32 %v1040_v16, %v841_v27  ;;  %v842_v48 = vpop.f32.mrf.mxu1 }
 0x1ec   : > { %v1446_v3 = vadd.f32 %v1401_v22, %v1085_v40  ;;  %v1772_v21 = vpop.f32.mrf.mxu0  ;;  %v843_v22 = vadd.f32 %v842_v48, %v5773_v58  ;;  %v1411_v52 = vpop.f32.mrf.mxu3  ;;  %v2808_v40 = vsel %vm2793_vm7, %v2805_v51, %v2807_v54 }
 0x1ee   : > { %v5161_v42 = vadd.f32 %v1770_v47, %v1446_v3  ;;  %v2203_v47 = vsel %vm1827_vm6, %v2200_v2, %v2202_v1  ;;  %v2512_v2 = vor.u32 %v2511_v8, %v2508_v6  ;;  %v2809_v6 = vrot.slane %v5123_v55, 3 }
 0x1f0   : > { %v2513_v19 = vsel %vm2424_vm5, %v2503_v63, %v2512_v2  ;;  %v2518_v63 = vshll.u32 %v5186_v7, 16 }
 0x1f1   : > { %v1042_v62 = vpop.f32.mrf.mxu2 }
 0x1f2   : > { %v1086_v50 = vadd.f32 %v1042_v62, %v843_v22  ;;  %v845_v15 = vpop.f32.mrf.mxu1  ;;  %v4175_v62 = vld [vmem:[%s4438_s29 + $0x48] sm:$0xff] }
 0x1f4   : > { %v1447_v27 = vadd.f32 %v5119_v53, %v1086_v50  ;;  %v1775_v16 = vpop.f32.mrf.mxu0  ;;  %v5774_v53 = vld [vmem:[#allocation11_spill] sm:$0xff]  ;;  %v5182_v3 = vpop.f32.mrf.mxu3  ;;  %v1843_v50 = vrot.slane %v4175_v62, 2 }
 0x1f5   : > { %3886 = vmatmul.msk.bf16.gmra.mxu1 %vm559_vm2, %v1842_v32  ;;  %v846_v48 = vadd.f32 %v845_v15, %v5774_v53  ;;  %v2204_v15 = vrot.slane %v5123_v55, 2  ;;  %v2515_v32 = vshrl.u32 %v5186_v7, 16  ;;  %v3074_v55 = vld [vmem:[%s5749_s2 + $0x78] sm:$0xff] }
 0x1f6   : > { %3973 = vmatmul.msk.bf16.gmra.mxu2 %vm559_vm2, %v2203_v47  ;;  %v5178_v5 = vadd.f32 %v1772_v21, %v1447_v27  ;;  %v3070_v21 = vld [vmem:[%s5749_s2 + $0x58] sm:$0xff]  ;;  %3172 = vperm.xlu0 %4162, %v3074_v55  }
 0x1f7   : > { %4011 = vmatmul.msk.bf16.gmra.mxu0 %vm559_vm2, %v2808_v40  ;;  %3152 = vperm.xlu2 %4164, %v3070_v21   ;;  %v5775_v47 = vld [vmem:[#allocation12_spill] sm:$0xff]  ;;  %v2205_v53 = vsel %vm1827_vm6, %v2202_v1, %v2204_v15 }
 0x1f8   : > { %3994 = vmatmul.msk.bf16.gmra.mxu3 %vm559_vm2, %v2513_v19 }
 0x1f9   : > { %v1045_v59 = vpop.f32.mrf.mxu2 }
 0x1fa   : > { %v1087_v51 = vadd.f32 %v1045_v59, %v846_v48  ;;  %v847_v13 = vpop.f32.mrf.mxu1  ;;  %v2517_v48 = vrot.slane %v2515_v32, 2  ;;  %v2520_v59 = vrot.slane %v2518_v63, 3 }
 0x1fc   : > { %v1448_v20 = vadd.f32 %v1406_v41, %v1087_v51  ;;  %v1777_v58 = vpop.f32.mrf.mxu0  ;;  %v848_v41 = vadd.f32 %v847_v13, %v5775_v47  ;;  %v5200_v27 = vpop.f32.mrf.mxu3  ;;  %v2521_v1 = vor.u32 %v2520_v59, %v2517_v48  ;;  %v5219_v47 = vld [vmem:[%s4438_s29 + $0x68] sm:$0xff] }
 0x1fd   : > { %v2524_v48 = vshrl.u32 %v5219_v47, 16  ;;  %v5777_v59 = vld [vmem:[#allocation14_spill] sm:$0xff] }
 0x1fe   : > { %v5192_v22 = vadd.f32 %v1775_v16, %v1448_v20  ;;  %v1844_v16 = vsel %vm1827_vm6, %v1841_v33, %v1843_v50  ;;  %v2810_v20 = vsel %vm2793_vm7, %v2807_v54, %v2809_v6  ;;  %v2522_v63 = vsel %vm2424_vm5, %v2512_v2, %v2521_v1 }
 0x1ff   : > { %v2527_v2 = vshll.u32 %v5219_v47, 16 }
 0x201   : > { %v1047_v8 = vpop.f32.mrf.mxu2 }
 0x202   : > { %v1088_v40 = vadd.f32 %v1047_v8, %v848_v41  ;;  %v850_v43 = vpop.f32.mrf.mxu1 }
 0x204   : > { %v1449_v51 = vadd.f32 %v5151_v36, %v1088_v40  ;;  %v1780_v19 = vpop.f32.mrf.mxu0  ;;  %v5776_v36 = vld [vmem:[#allocation13_spill] sm:$0xff]  ;;  %v5215_v62 = vpop.f32.mrf.mxu3 }
 0x205   : > { %3887 = vmatmul.msk.bf16.gmra.mxu1 %vm559_vm2, %v1844_v16  ;;  %v851_v13 = vadd.f32 %v850_v43, %v5776_v36  ;;  %v4176_v43 = vld [vmem:[%s4438_s29 + $0x50] sm:$0xff] }
 0x206   : > { %3974 = vmatmul.msk.bf16.gmra.mxu2 %vm559_vm2, %v2205_v53  ;;  %v5211_v33 = vadd.f32 %v1777_v58, %v1449_v51  ;;  %v3075_v58 = vld [vmem:[%s5749_s2 + $0x80] sm:$0xff]  ;;  %v1845_v16 = vrot.slane %v4176_v43, 2  ;;  %v2206_v53 = vrot.slane %v5155_v49, 2  ;;  %v2811_v51 = vrot.slane %v5155_v49, 3  ;;  %v3073_v49 = vld [vmem:[%s5749_s2 + $0x70] sm:$0xff] }
 0x207   : > { %4012 = vmatmul.msk.bf16.gmra.mxu0 %vm559_vm2, %v2810_v20  ;;  %3177 = vperm.xlu1 %4163, %v3075_v58  }
 0x208   : > { %3995 = vmatmul.msk.bf16.gmra.mxu3 %vm559_vm2, %v2522_v63  ;;  %v2529_v63 = vrot.slane %v2527_v2, 3  ;;  %v2812_v43 = vsel %vm2793_vm7, %v2809_v6, %v2811_v51  ;;  %3167 = vperm.xlu2 %4164, %v3073_v49  }
 0x209   : > { %v1050_v21 = vpop.f32.mrf.mxu2 }
 0x20a   : > { %v1089_v54 = vadd.f32 %v1050_v21, %v851_v13  ;;  %v852_v32 = vpop.f32.mrf.mxu1  ;;  %v2207_v21 = vsel %vm1827_vm6, %v2204_v15, %v2206_v53 }
 0x20c   : > { %v1450_v41 = vadd.f32 %v1411_v52, %v1089_v54  ;;  %v1782_v8 = vpop.f32.mrf.mxu0  ;;  %v853_v52 = vadd.f32 %v852_v32, %v5777_v59  ;;  %v5233_v55 = vpop.f32.mrf.mxu3  ;;  %v2526_v54 = vrot.slane %v2524_v48, 2 }
 0x20d   : > { %v3098_v59 = vpop.permute.xlu0 %3097 }
 0x20e   : > { %v5225_v40 = vadd.f32 %v1780_v19, %v1450_v41  ;;  %v1846_v19 = vsel %vm1827_vm6, %v1843_v50, %v1845_v16 }
 0x211   : > { %v1052_v20 = vpop.f32.mrf.mxu2 }
 0x212   : > { %v1090_v36 = vadd.f32 %v1052_v20, %v853_v52  ;;  %v1931_v13 = vpop.f32.mrf.mxu1  ;;  %v5256_v20 = vld [vmem:[%s4438_s29 + $0x70] sm:$0xff] }
 0x213   : > { %v2021_v15 = vadd.f32 %v1931_v13, %v4775_v34  ;;  %v5264_v13 = vld [vmem:[%s4438_s29 + $0x58] sm:$0xff] }
 0x214   : > { %v1451_v41 = vadd.f32 %v5182_v3, %v1090_v36  ;;  %v2897_v58 = vpop.f32.mrf.mxu0  ;;  %v2530_v3 = vor.u32 %v2529_v63, %v2526_v54  ;;  %v5252_v32 = vpop.f32.mrf.mxu3  ;;  %v2208_v54 = vrot.slane %v5186_v7, 2  ;;  %v2536_v63 = vshll.u32 %v5256_v20, 16 }
 0x215   : > { %3888 = vmatmul.msk.bf16.gmra.mxu1 %vm559_vm2, %v1846_v19  ;;  %v3077_v19 = vld [vmem:[%s5749_s2 + $0x90] sm:$0xff] }
 0x216   : > { %3975 = vmatmul.msk.bf16.gmra.mxu2 %vm559_vm2, %v2207_v21  ;;  %v5247_v50 = vadd.f32 %v1782_v8, %v1451_v41  ;;  %v2531_v52 = vsel %vm2424_vm5, %v2521_v1, %v2530_v3  ;;  %3187 = vperm.xlu0 %4162, %v3077_v19   ;;  %v1847_v21 = vrot.slane %v5264_v13, 2  ;;  %v2533_v1 = vshrl.u32 %v5256_v20, 16 }
 0x217   : > { %4013 = vmatmul.msk.bf16.gmra.mxu0 %vm559_vm2, %v2812_v43  ;;  %v5755_v41 = vrot.slane %v5186_v7, 3  ;;  %v5779_v13 = vrot.slane %v5186_v7, 3  ;;  %v3086_v7 = vld [vmem:[%s5749_s2 + $0xd8] sm:$0xff] }
 0x218   : > { %5778 = vst [vmem:[#allocation15_spill] sm:$0xff] %v5247_v50  ;;  %3996 = vmatmul.msk.bf16.gmra.mxu3 %vm559_vm2, %v2531_v52  ;;  %v2538_v52 = vrot.slane %v2536_v63, 3 }
 0x219   : > { %v2292_v6 = vpop.f32.mrf.mxu2 }
 0x21a   : > { %v2382_v48 = vadd.f32 %v2292_v6, %v2021_v15  ;;  %v1933_v2 = vpop.f32.mrf.mxu1  ;;  %v3078_v15 = vld [vmem:[%s5749_s2 + $0x98] sm:$0xff] }
 0x21b   : > { %3192 = vperm.xlu1 %4163, %v3078_v15  }
 0x21c   : > { %v2751_v8 = vadd.f32 %v5200_v27, %v2382_v48  ;;  %v2899_v36 = vpop.f32.mrf.mxu0  ;;  %v2022_v27 = vadd.f32 %v1933_v2, %v4785_v26  ;;  %v5275_v43 = vpop.f32.mrf.mxu3  ;;  %v1848_v48 = vsel %vm1827_vm6, %v1845_v16, %v1847_v21  ;;  %v2209_v26 = vsel %vm1827_vm6, %v2206_v53, %v2208_v54 }
 0x21d   : > { %v2535_v2 = vrot.slane %v2533_v1, 2 }
 0x21e   : > { %v2987_v34 = vadd.f32 %v2897_v58, %v2751_v8 }
 0x21f   : > { %v5293_v53 = vor.u32 %v2538_v52, %v2535_v2  ;;  %v5308_v52 = vld [vmem:[%s4438_s29 + $0x78] sm:$0xff] }
 0x220   : > { %3023 = vst [vmem:[%s5270_s7] sm:$0xff] %v2987_v34  ;;  %v3275_v50 = vmul.f32 %v3098_v59, %v2987_v34 }
 0x221   : > { %v2294_v58 = vpop.f32.mrf.mxu2  ;;  %v2540_v2 = vsel %vm2424_vm5, %v2530_v3, %v5293_v53  ;;  %v2210_v3 = vrot.slane %v5219_v47, 2 }
 0x222   : > { %v2383_v49 = vadd.f32 %v2294_v58, %v2022_v27  ;;  %v1936_v6 = vpop.f32.mrf.mxu1  ;;  %v2814_v27 = vsel %vm2793_vm7, %v2811_v51, %v5755_v41  ;;  %v3103_v58 = vpop.permute.xlu0 %3102  ;;  %v3080_v51 = vld [vmem:[%s5749_s2 + $0xa8] sm:$0xff] }
 0x223   : > { %v2023_v1 = vadd.f32 %v1936_v6, %v4791_v18  ;;  %3202 = vperm.xlu0 %4162, %v3080_v51   ;;  %v3081_v18 = vld [vmem:[%s5749_s2 + $0xb0] sm:$0xff]  ;;  %v2545_v51 = vshll.u32 %v5308_v52, 16 }
 0x224   : > { %v2752_v8 = vadd.f32 %v5215_v62, %v2383_v49  ;;  %v2902_v19 = vpop.f32.mrf.mxu0  ;;  %v5300_v59 = vpop.f32.mrf.mxu3  ;;  %v3352_v49 = vmul.f32 %v3275_v50, %v2987_v34  ;;  %3207 = vperm.xlu1 %4163, %v3081_v18  }
 0x225   : > { %3889 = vmatmul.msk.bf16.gmra.mxu1 %vm559_vm2, %v1848_v48 }
 0x226   : > { %3976 = vmatmul.msk.bf16.gmra.mxu2 %vm559_vm2, %v2209_v26  ;;  %v2988_v16 = vadd.f32 %v2899_v36, %v2752_v8  ;;  %v3108_v26 = vpop.permute.xlu1 %3107 }
 0x227   : > { %4014 = vmatmul.msk.bf16.gmra.mxu0 %vm559_vm2, %v2814_v27  ;;  %v3076_v27 = vld [vmem:[%s5749_s2 + $0x88] sm:$0xff] }
 0x228   : > { %3024 = vst [vmem:[%s5270_s7 + $0x8] sm:$0xff] %v2988_v16  ;;  %v3276_v62 = vmul.f32 %v3103_v58, %v2988_v16  ;;  %3182 = vperm.xlu2 %4164, %v3076_v27   ;;  %3997 = vmatmul.msk.bf16.gmra.mxu3 %vm559_vm2, %v2540_v2  ;;  %v3084_v27 = vld [vmem:[%s5749_s2 + $0xc8] sm:$0xff] }
 0x229   : > { %v2297_v63 = vpop.f32.mrf.mxu2 }
 0x22a   : > { %v3311_v15 = vadd.f32 %v3276_v62, %v3275_v50  ;;  %v3353_v36 = vmul.f32 %v3276_v62, %v2988_v16  ;;  %v2384_v48 = vadd.f32 %v2297_v63, %v2023_v1  ;;  %v1938_v6 = vpop.f32.mrf.mxu1  ;;  %v5316_v16 = vld [vmem:[%s4438_s29 + $0x60] sm:$0xff]  ;;  %v2542_v62 = vshrl.u32 %v5308_v52, 16 }
 0x22b   : > { %v1849_v1 = vrot.slane %v5316_v16, 2 }
 0x22c   : > { %v3388_v8 = vadd.f32 %v3353_v36, %v3352_v49  ;;  %v2753_v34 = vadd.f32 %v5233_v55, %v2384_v48  ;;  %v2904_v50 = vpop.f32.mrf.mxu0  ;;  %v2024_v55 = vadd.f32 %v1938_v6, %v4801_v30  ;;  %v2815_v49 = vrot.slane %v5219_v47, 3  ;;  %v5328_v48 = vpop.f32.mrf.mxu3  ;;  %3222 = vperm.xlu1 %4163, %v3084_v27   ;;  %v3087_v27 = vld [vmem:[%s5749_s2 + $0xe0] sm:$0xff] }
 0x22d   : > { %v1850_v30 = vsel %vm1827_vm6, %v1847_v21, %v1849_v1  ;;  %v2544_v6 = vrot.slane %v2542_v62, 2 }
 0x22e   : > { %v2989_v58 = vadd.f32 %v2902_v19, %v2753_v34  ;;  %v3083_v19 = vld [vmem:[%s5749_s2 + $0xc0] sm:$0xff]  ;;  %v2816_v21 = vsel %vm2793_vm7, %v5779_v13, %v2815_v49 }
 0x22f   : > { %3217 = vperm.xlu0 %4162, %v3083_v19   ;;  %v3113_v19 = vpop.permute.xlu1 %3112 }
 0x230   : > { %3025 = vst [vmem:[%s5270_s7 + $0x10] sm:$0xff] %v2989_v58  ;;  %v3277_v63 = vmul.f32 %v3108_v26, %v2989_v58  ;;  %v2547_v26 = vrot.slane %v2545_v51, 3 }
 0x231   : > { %v2299_v36 = vpop.f32.mrf.mxu2 }
 0x232   : > { %v3312_v18 = vadd.f32 %v3311_v15, %v3277_v63  ;;  %v3354_v2 = vmul.f32 %v3277_v63, %v2989_v58  ;;  %v2385_v34 = vadd.f32 %v2299_v36, %v2024_v55  ;;  %v1941_v41 = vpop.f32.mrf.mxu1  ;;  %v2211_v15 = vsel %vm1827_vm6, %v2208_v54, %v2210_v3 }
 0x233   : > { %v5352_v54 = vor.u32 %v2547_v26, %v2544_v6 }
 0x234   : > { %v3389_v58 = vadd.f32 %v3388_v8, %v3354_v2  ;;  %v2754_v55 = vadd.f32 %v5252_v32, %v2385_v34  ;;  %v2907_v63 = vpop.f32.mrf.mxu0  ;;  %v2025_v32 = vadd.f32 %v1941_v41, %v4807_v60  ;;  %v5359_v51 = vpop.f32.mrf.mxu3  ;;  %3237 = vperm.xlu1 %4163, %v3087_v27  }
 0x235   : > { %3890 = vmatmul.msk.bf16.gmra.mxu1 %vm559_vm2, %v1850_v30  ;;  %v3118_v60 = vpop.permute.xlu2 %3117  ;;  %v2549_v41 = vsel %vm2424_vm5, %v5293_v53, %v5352_v54  ;;  %v2212_v53 = vrot.slane %v5256_v20, 2 }
 0x236   : > { %3977 = vmatmul.msk.bf16.gmra.mxu2 %vm559_vm2, %v2211_v15  ;;  %v2990_v36 = vadd.f32 %v2904_v50, %v2754_v55  ;;  %v5368_v15 = vld [vmem:[%s4438_s29 + $0x80] sm:$0xff] }
 0x237   : > { %4015 = vmatmul.msk.bf16.gmra.mxu0 %vm559_vm2, %v2816_v21  ;;  %3232 = vperm.xlu0 %4162, %v3086_v7   ;;  %v3079_v55 = vld [vmem:[%s5749_s2 + $0xa0] sm:$0xff]  ;;  %v5376_v21 = vld [vmem:[%s4438_s29 + $0x68] sm:$0xff] }
 0x238   : > { %3026 = vst [vmem:[%s5270_s7 + $0x18] sm:$0xff] %v2990_v36  ;;  %v3278_v8 = vmul.f32 %v3113_v19, %v2990_v36  ;;  %3197 = vperm.xlu2 %4164, %v3079_v55   ;;  %3998 = vmatmul.msk.bf16.gmra.mxu3 %vm559_vm2, %v2549_v41  ;;  %v1851_v19 = vrot.slane %v5376_v21, 2  ;;  %v3090_v41 = vld [vmem:[%s5749_s2 + $0xf8] sm:$0xff] }
 0x239   : > { %v2302_v62 = vpop.f32.mrf.mxu2 }
 0x23a   : > { %v3313_v2 = vadd.f32 %v3312_v18, %v3278_v8  ;;  %v3355_v50 = vmul.f32 %v3278_v8, %v2990_v36  ;;  %v2386_v34 = vadd.f32 %v2302_v62, %v2025_v32  ;;  %v1943_v30 = vpop.f32.mrf.mxu1  ;;  %v2551_v36 = vshrl.u32 %v5368_v15, 16 }
 0x23b   : > { %v2817_v8 = vrot.slane %v5256_v20, 3 }
 0x23c   : > { %v3390_v6 = vadd.f32 %v3389_v58, %v3355_v50  ;;  %v2755_v18 = vadd.f32 %v5275_v43, %v2386_v34  ;;  %v2909_v26 = vpop.f32.mrf.mxu0  ;;  %v2554_v58 = vshll.u32 %v5368_v15, 16  ;;  %v2026_v43 = vadd.f32 %v1943_v30, %v4817_v37  ;;  %v5388_v62 = vpop.f32.mrf.mxu3  ;;  %3252 = vperm.xlu1 %4163, %v3090_v41   ;;  %v5431_v41 = vld [vmem:[%s4438_s29 + $0x88] sm:$0xff] }
 0x23d   : > { %v1852_v37 = vsel %vm1827_vm6, %v1849_v1, %v1851_v19  ;;  %v2213_v30 = vsel %vm1827_vm6, %v2210_v3, %v2212_v53  ;;  %v2818_v16 = vsel %vm2793_vm7, %v2815_v49, %v2817_v8  ;;  %v3082_v1 = vld [vmem:[%s5749_s2 + $0xb8] sm:$0xff] }
 0x23e   : > { %v2991_v13 = vadd.f32 %v2907_v63, %v2755_v18  ;;  %v3089_v63 = vld [vmem:[%s5749_s2 + $0xf0] sm:$0xff] }
 0x23f   : > { %3247 = vperm.xlu0 %4162, %v3089_v63  }
 0x240   : > { %3027 = vst [vmem:[%s5270_s7 + $0x20] sm:$0xff] %v2991_v13  ;;  %v3279_v32 = vmul.f32 %v3118_v60, %v2991_v13  ;;  %v2556_v60 = vrot.slane %v2554_v58, 3  ;;  %3212 = vperm.xlu2 %4164, %v3082_v1  }
 0x241   : > { %v2304_v7 = vpop.f32.mrf.mxu2 }
 0x242   : > { %v3314_v50 = vadd.f32 %v3313_v2, %v3279_v32  ;;  %v3356_v34 = vmul.f32 %v3279_v32, %v2991_v13  ;;  %v2387_v27 = vadd.f32 %v2304_v7, %v2026_v43  ;;  %v1946_v18 = vpop.f32.mrf.mxu1  ;;  %v2553_v2 = vrot.slane %v2551_v36, 2  ;;  %v3123_v32 = vpop.permute.xlu2 %3122 }
 0x243   : > { %v2027_v47 = vadd.f32 %v1946_v18, %v4823_v10 }
 0x244   : > { %v3391_v55 = vadd.f32 %v3390_v6, %v3356_v34  ;;  %v2756_v13 = vadd.f32 %v5300_v59, %v2387_v27  ;;  %v2912_v43 = vpop.f32.mrf.mxu0  ;;  %v5415_v59 = vor.u32 %v2556_v60, %v2553_v2  ;;  %v3092_v6 = vld [vmem:[%s5749_s2 + $0x108] sm:$0xff]  ;;  %v5422_v58 = vpop.f32.mrf.mxu3  ;;  %v3093_v34 = vld [vmem:[%s5749_s2 + $0x110] sm:$0xff] }
 0x245   : > { %3891 = vmatmul.msk.bf16.gmra.mxu1 %vm559_vm2, %v1852_v37  ;;  %3267 = vperm.xlu1 %4163, %v3093_v34   ;;  %v3128_v2 = vpop.permute.xlu0 %3127 }
 0x246   : > { %3978 = vmatmul.msk.bf16.gmra.mxu2 %vm559_vm2, %v2213_v30  ;;  %v2992_v3 = vadd.f32 %v2909_v26, %v2756_v13  ;;  %v2558_v10 = vsel %vm2424_vm5, %v5352_v54, %v5415_v59  ;;  %v3085_v30 = vld [vmem:[%s5749_s2 + $0xd0] sm:$0xff] }
 0x247   : > { %4016 = vmatmul.msk.bf16.gmra.mxu0 %vm559_vm2, %v2818_v16  ;;  %3262 = vperm.xlu0 %4162, %v3092_v6   ;;  %v5439_v13 = vld [vmem:[%s4438_s29 + $0x70] sm:$0xff]  ;;  %v2214_v16 = vrot.slane %v5308_v52, 2 }
 0x248   : > { %3028 = vst [vmem:[%s5270_s7 + $0x28] sm:$0xff] %v2992_v3  ;;  %v3280_v49 = vmul.f32 %v3123_v32, %v2992_v3  ;;  %3227 = vperm.xlu2 %4164, %v3085_v30   ;;  %3999 = vmatmul.msk.bf16.gmra.mxu3 %vm559_vm2, %v2558_v10  ;;  %v1853_v54 = vrot.slane %v5439_v13, 2  ;;  %v3133_v30 = vpop.permute.xlu1 %3132 }
 0x249   : > { %v2307_v36 = vpop.f32.mrf.mxu2 }
 0x24a   : > { %v3315_v63 = vadd.f32 %v3314_v50, %v3280_v49  ;;  %v3357_v26 = vmul.f32 %v3280_v49, %v2992_v3  ;;  %v2388_v7 = vadd.f32 %v2307_v36, %v2027_v47  ;;  %v1948_v27 = vpop.f32.mrf.mxu1  ;;  %v2819_v3 = vrot.slane %v5308_v52, 3 }
 0x24b   : > { %v2028_v1 = vadd.f32 %v1948_v27, %v4833_v0  ;;  %v2215_v0 = vsel %vm1827_vm6, %v2212_v53, %v2214_v16 }
 0x24c   : > { %v3392_v18 = vadd.f32 %v3391_v55, %v3357_v26  ;;  %v2757_v37 = vadd.f32 %v5328_v48, %v2388_v7  ;;  %v2914_v50 = vpop.f32.mrf.mxu0  ;;  %v2560_v55 = vshrl.u32 %v5431_v41, 16  ;;  %v2563_v48 = vshll.u32 %v5431_v41, 16 }
 0x24d   : > { %v1854_v7 = vsel %vm1827_vm6, %v1851_v19, %v1853_v54  ;;  %v2820_v21 = vsel %vm2793_vm7, %v2817_v8, %v2819_v3  ;;  %v3088_v19 = vld [vmem:[%s5749_s2 + $0xe8] sm:$0xff] }
 0x24e   : > { %v2993_v60 = vadd.f32 %v2912_v43, %v2757_v37  ;;  %v5448_v43 = vpop.f32.mrf.mxu3  ;;  %v2562_v34 = vrot.slane %v2560_v55, 2  ;;  %v2565_v27 = vrot.slane %v2563_v48, 3 }
 0x250   : > { %3029 = vst [vmem:[%s5270_s7 + $0x30] sm:$0xff] %v2993_v60  ;;  %v3281_v32 = vmul.f32 %v3128_v2, %v2993_v60  ;;  %3242 = vperm.xlu2 %4164, %v3088_v19  }
 0x251   : > { %v2309_v47 = vpop.f32.mrf.mxu2 }
 0x252   : > { %v3316_v49 = vadd.f32 %v3315_v63, %v3281_v32  ;;  %v3358_v6 = vmul.f32 %v3281_v32, %v2993_v60  ;;  %v2389_v36 = vadd.f32 %v2309_v47, %v2028_v1  ;;  %v1951_v26 = vpop.f32.mrf.mxu1 }
 0x254   : > { %v3393_v10 = vadd.f32 %v3392_v18, %v3358_v6  ;;  %v2758_v63 = vadd.f32 %v5359_v51, %v2389_v36  ;;  %v2917_v37 = vpop.f32.mrf.mxu0  ;;  %v2566_v51 = vor.u32 %v2565_v27, %v2562_v34  ;;  %v2029_v18 = vadd.f32 %v1951_v26, %v4839_v11  ;;  %v3091_v36 = vld [vmem:[%s5749_s2 + $0x100] sm:$0xff]  ;;  %v3138_v26 = vpop.permute.xlu2 %3137 }
 0x255   : > { %3892 = vmatmul.msk.bf16.gmra.mxu1 %vm559_vm2, %v1854_v7  ;;  %v5487_v7 = vld [vmem:[%s4438_s29 + $0x78] sm:$0xff] }
 0x256   : > { %3979 = vmatmul.msk.bf16.gmra.mxu2 %vm559_vm2, %v2215_v0  ;;  %v2994_v53 = vadd.f32 %v2914_v50, %v2758_v63  ;;  %v5474_v2 = vpop.f32.mrf.mxu3  ;;  %v2567_v32 = vsel %vm2424_vm5, %v5415_v59, %v2566_v51  ;;  %v5479_v50 = vld [vmem:[%s4438_s29 + $0x90] sm:$0xff]  ;;  %v1855_v0 = vrot.slane %v5487_v7, 2  ;;  %v2216_v59 = vrot.slane %v5368_v15, 2 }
 0x257   : > { %4017 = vmatmul.msk.bf16.gmra.mxu0 %vm559_vm2, %v2820_v21  ;;  %v2569_v34 = vshrl.u32 %v5479_v50, 16  ;;  %v2821_v63 = vrot.slane %v5368_v15, 3 }
 0x258   : > { %3030 = vst [vmem:[%s5270_s7 + $0x38] sm:$0xff] %v2994_v53  ;;  %v3282_v20 = vmul.f32 %v3133_v30, %v2994_v53  ;;  %3257 = vperm.xlu2 %4164, %v3091_v36   ;;  %4000 = vmatmul.msk.bf16.gmra.mxu3 %vm559_vm2, %v2567_v32  ;;  %v3143_v32 = vpop.permute.xlu0 %3142 }
 0x259   : > { %v2312_v8 = vpop.f32.mrf.mxu2  ;;  %v2822_v13 = vsel %vm2793_vm7, %v2819_v3, %v2821_v63 }
 0x25a   : > { %v3317_v60 = vadd.f32 %v3316_v49, %v3282_v20  ;;  %v3359_v55 = vmul.f32 %v3282_v20, %v2994_v53  ;;  %v2390_v48 = vadd.f32 %v2312_v8, %v2029_v18  ;;  %v1953_v1 = vpop.f32.mrf.mxu1  ;;  %v1856_v20 = vsel %vm1827_vm6, %v1853_v54, %v1855_v0  ;;  %v3094_v54 = vld [vmem:[%s5749_s2 + $0x118] sm:$0xff] }
 0x25b   : > { %v2030_v27 = vadd.f32 %v1953_v1, %v4849_v17  ;;  %v2217_v17 = vsel %vm1827_vm6, %v2214_v16, %v2216_v59  ;;  %v2571_v8 = vrot.slane %v2569_v34, 2 }
 0x25c   : > { %v3394_v47 = vadd.f32 %v3393_v10, %v3359_v55  ;;  %v2759_v6 = vadd.f32 %v5388_v62, %v2390_v48  ;;  %v2919_v11 = vpop.f32.mrf.mxu0  ;;  %v2572_v62 = vshll.u32 %v5479_v50, 16 }
 0x25e   : > { %v2995_v49 = vadd.f32 %v2917_v37, %v2759_v6  ;;  %v5496_v37 = vpop.f32.mrf.mxu3  ;;  %v2574_v55 = vrot.slane %v2572_v62, 3 }
 0x260   : > { %3031 = vst [vmem:[%s5270_s7 + $0x40] sm:$0xff] %v2995_v49  ;;  %v3283_v10 = vmul.f32 %v3138_v26, %v2995_v49  ;;  %3272 = vperm.xlu2 %4164, %v3094_v54  }
 0x261   : > { %v2314_v21 = vpop.f32.mrf.mxu2 }
 0x262   : > { %v3318_v19 = vadd.f32 %v3317_v60, %v3283_v10  ;;  %v3360_v30 = vmul.f32 %v3283_v10, %v2995_v49  ;;  %v2391_v53 = vadd.f32 %v2314_v21, %v2030_v27  ;;  %v1956_v18 = vpop.f32.mrf.mxu1  ;;  %v5526_v27 = vld [vmem:[%s4438_s29 + $0x98] sm:$0xff] }
 0x264   : > { %v3395_v48 = vadd.f32 %v3394_v47, %v3360_v30  ;;  %v2760_v60 = vadd.f32 %v5422_v58, %v2391_v53  ;;  %v2922_v1 = vpop.f32.mrf.mxu0  ;;  %v2575_v58 = vor.u32 %v2574_v55, %v2571_v8  ;;  %v2031_v47 = vadd.f32 %v1956_v18, %v4855_v38  ;;  %v3148_v38 = vpop.permute.xlu1 %3147  ;;  %v5531_v53 = vld [vmem:[%s4438_s29 + $0x80] sm:$0xff] }
 0x265   : > { %3893 = vmatmul.msk.bf16.gmra.mxu1 %vm559_vm2, %v1856_v20  ;;  %v2218_v18 = vrot.slane %v5431_v41, 2  ;;  %v2578_v20 = vshrl.u32 %v5526_v27, 16 }
 0x266   : > { %3980 = vmatmul.msk.bf16.gmra.mxu2 %vm559_vm2, %v2217_v17  ;;  %v2996_v16 = vadd.f32 %v2919_v11, %v2760_v60  ;;  %v5522_v6 = vpop.f32.mrf.mxu3  ;;  %v2576_v62 = vsel %vm2424_vm5, %v2566_v51, %v2575_v58  ;;  %v2581_v51 = vshll.u32 %v5526_v27, 16 }
 0x267   : > { %4018 = vmatmul.msk.bf16.gmra.mxu0 %vm559_vm2, %v2822_v13 }
 0x268   : > { %3032 = vst [vmem:[%s5270_s7 + $0x48] sm:$0xff] %v2996_v16  ;;  %v3284_v52 = vmul.f32 %v3143_v32, %v2996_v16  ;;  %4001 = vmatmul.msk.bf16.gmra.mxu3 %vm559_vm2, %v2576_v62 }
 0x269   : > { %v2317_v3 = vpop.f32.mrf.mxu2 }
 0x26a   : > { %v3319_v36 = vadd.f32 %v3318_v19, %v3284_v52  ;;  %v3361_v26 = vmul.f32 %v3284_v52, %v2996_v16  ;;  %v2392_v49 = vadd.f32 %v2317_v3, %v2031_v47  ;;  %v1958_v34 = vpop.f32.mrf.mxu1  ;;  %v1857_v19 = vrot.slane %v5531_v53, 2 }
 0x26b   : > { %v2032_v17 = vadd.f32 %v1958_v34, %v4865_v31  ;;  %v2219_v31 = vsel %vm1827_vm6, %v2216_v59, %v2218_v18  ;;  %v2580_v16 = vrot.slane %v2578_v20, 2  ;;  %v2583_v47 = vrot.slane %v2581_v51, 3 }
 0x26c   : > { %v3396_v11 = vadd.f32 %v3395_v48, %v3361_v26  ;;  %v2761_v10 = vadd.f32 %v5448_v43, %v2392_v49  ;;  %v2924_v21 = vpop.f32.mrf.mxu0  ;;  %v2823_v43 = vrot.slane %v5431_v41, 3  ;;  %v1858_v32 = vsel %vm1827_vm6, %v1855_v0, %v1857_v19  ;;  %v2418_v0 = vld [vmem:[%s4438_s29 + $0xa0] sm:$0x7]  ;;  %v3153_v26 = vpop.permute.xlu2 %3152 }
 0x26d   : > { %v2584_v49 = vor.u32 %v2583_v47, %v2580_v16  ;;  %v2422_v34 = vunpack.c.l.b16 %v2418_v0  ;;  %v2825_v47 = vrot.slane %v5479_v50, 3 }
 0x26e   : > { %v2997_v30 = vadd.f32 %v2922_v1, %v2761_v10  ;;  %v5540_v48 = vpop.f32.mrf.mxu3  ;;  %v2824_v7 = vsel %vm2793_vm7, %v2821_v63, %v2823_v43 }
 0x26f   : > { %v2585_v20 = vsel %vm2424_vm5, %v2575_v58, %v2584_v49  ;;  %v5780_v58 = vld [vmem:[#allocation17_spill] sm:$0xff] }
 0x270   : > { %3033 = vst [vmem:[%s5270_s7 + $0x50] sm:$0xff] %v2997_v30  ;;  %v3285_v8 = vmul.f32 %v3148_v38, %v2997_v30 }
 0x271   : > { %v2319_v55 = vpop.f32.mrf.mxu2 }
 0x272   : > { %v3320_v60 = vadd.f32 %v3319_v36, %v3285_v8  ;;  %v3362_v1 = vmul.f32 %v3285_v8, %v2997_v30  ;;  %v2393_v13 = vadd.f32 %v2319_v55, %v2032_v17  ;;  %v1961_v54 = vpop.f32.mrf.mxu1 }
 0x274   : > { %v3397_v52 = vadd.f32 %v3396_v11, %v3362_v1  ;;  %v2762_v3 = vadd.f32 %v5474_v2, %v2393_v13  ;;  %v2927_v36 = vpop.f32.mrf.mxu0  ;;  %v2033_v2 = vadd.f32 %v1961_v54, %v4874_v35  ;;  %v3158_v35 = vpop.permute.xlu0 %3157  ;;  %v4183_v1 = vld [vmem:[%s4438_s29 + $0x88] sm:$0xff] }
 0x275   : > { %3894 = vmatmul.msk.bf16.gmra.mxu1 %vm559_vm2, %v1858_v32  ;;  %v1859_v13 = vrot.slane %v4183_v1, 2 }
 0x276   : > { %3981 = vmatmul.msk.bf16.gmra.mxu2 %vm559_vm2, %v2219_v31  ;;  %v2998_v59 = vadd.f32 %v2924_v21, %v2762_v3  ;;  %v5564_v15 = vpop.f32.mrf.mxu3  ;;  %v5567_v21 = vpack.c.b16 %v2422_v34, %v2422_v34 }
 0x277   : > { %4019 = vmatmul.msk.bf16.gmra.mxu0 %vm559_vm2, %v2824_v7 }
 0x278   : > { %3034 = vst [vmem:[%s5270_s7 + $0x58] sm:$0xff] %v2998_v59  ;;  %v3286_v62 = vmul.f32 %v3153_v26, %v2998_v59  ;;  %4002 = vmatmul.msk.bf16.gmra.mxu3 %vm559_vm2, %v2585_v20  ;;  %v2587_v54 = vshrl.u32 %v5567_v21, 16  ;;  %v2590_v32 = vshll.u32 %v5567_v21, 16  ;;  %v1860_v26 = vsel %vm1827_vm6, %v1857_v19, %v1859_v13  ;;  %v5781_v19 = vld [vmem:[#allocation18_spill] sm:$0xff] }
 0x279   : > { %v2322_v11 = vpop.f32.mrf.mxu2 }
 0x27a   : > { %v3321_v63 = vadd.f32 %v3320_v60, %v3286_v62  ;;  %v3363_v10 = vmul.f32 %v3286_v62, %v2998_v59  ;;  %v2394_v38 = vadd.f32 %v2322_v11, %v2033_v2  ;;  %v1963_v30 = vpop.f32.mrf.mxu1  ;;  %v2220_v60 = vrot.slane %v5479_v50, 2 }
 0x27b   : > { %v2034_v31 = vadd.f32 %v1963_v30, %v5780_v58  ;;  %v2589_v34 = vrot.slane %v2587_v54, 2  ;;  %v2592_v2 = vrot.slane %v2590_v32, 3  ;;  %v3168_v54 = vpop.permute.xlu2 %3167  ;;  %v4184_v58 = vld [vmem:[%s4438_s29 + $0x90] sm:$0xff] }
 0x27c   : > { %v3398_v51 = vadd.f32 %v3397_v52, %v3363_v10  ;;  %v2763_v17 = vadd.f32 %v5496_v37, %v2394_v38  ;;  %v2929_v8 = vpop.f32.mrf.mxu0  ;;  %v2221_v59 = vsel %vm1827_vm6, %v2218_v18, %v2220_v60  ;;  %v3163_v10 = vpop.permute.xlu1 %3162 }
 0x27d   : > { %v2593_v53 = vor.u32 %v2592_v2, %v2589_v34 }
 0x27e   : > { %v2999_v55 = vadd.f32 %v2927_v36, %v2763_v17  ;;  %v5578_v52 = vpop.f32.mrf.mxu3 }
 0x280   : > { %3035 = vst [vmem:[%s5270_s7 + $0x60] sm:$0xff] %v2999_v55  ;;  %v3287_v16 = vmul.f32 %v3158_v35, %v2999_v55 }
 0x281   : > { %v2324_v37 = vpop.f32.mrf.mxu2 }
 0x282   : > { %v3322_v3 = vadd.f32 %v3321_v63, %v3287_v16  ;;  %v3364_v36 = vmul.f32 %v3287_v16, %v2999_v55  ;;  %v2395_v7 = vadd.f32 %v2324_v37, %v2034_v31  ;;  %v1966_v0 = vpop.f32.mrf.mxu1  ;;  %v2826_v63 = vsel %vm2793_vm7, %v2823_v43, %v2825_v47 }
 0x283   : > { %v2035_v18 = vadd.f32 %v1966_v0, %v5781_v19  ;;  %v1861_v31 = vrot.slane %v4184_v58, 2  ;;  %v2222_v16 = vrot.slane %v5526_v27, 2 }
 0x284   : > { %v3399_v62 = vadd.f32 %v3398_v51, %v3364_v36  ;;  %v2764_v50 = vadd.f32 %v5522_v6, %v2395_v7  ;;  %v2932_v11 = vpop.f32.mrf.mxu0  ;;  %v2827_v36 = vrot.slane %v5526_v27, 3  ;;  %v3173_v27 = vpop.permute.xlu0 %3172 }
 0x285   : > { %3895 = vmatmul.msk.bf16.gmra.mxu1 %vm559_vm2, %v1860_v26  ;;  %v1862_v34 = vsel %vm1827_vm6, %v1859_v13, %v1861_v31  ;;  %v2223_v2 = vsel %vm1827_vm6, %v2220_v60, %v2222_v16 }
 0x286   : > { %v3000_v38 = vadd.f32 %v2929_v8, %v2764_v50  ;;  %3982 = vmatmul.msk.bf16.gmra.mxu2 %vm559_vm2, %v2221_v59  ;;  %v5595_v20 = vpop.f32.mrf.mxu3  ;;  %v2594_v8 = vsel %vm2424_vm5, %v2584_v49, %v2593_v53 }
 0x287   : > { %4020 = vmatmul.msk.bf16.gmra.mxu0 %vm559_vm2, %v2826_v63  ;;  %v2093_v63 = vld [vmem:[%s4438_s29 + $0xa0] sm:$0x3]  ;;  %s4093_s29 = smul.u32 288, %s4315_s21 }
 0x288   : > { %3036 = vst [vmem:[%s5270_s7 + $0x68] sm:$0xff] %v3000_v38  ;;  %v3288_v30 = vmul.f32 %v3163_v10, %v3000_v38  ;;  %4003 = vmatmul.msk.bf16.gmra.mxu3 %vm559_vm2, %v2594_v8 }
 0x289   : > { %v2327_v6 = vpop.f32.mrf.mxu2  ;;  %s3454_s17 = scalar_lea.hbm %s5750_s3, %s4093_s29  ;;  %s4205_s29 = scalar_lea.hbm %s5750_s3, 576 }
 0x28a   : > { %v3323_v41 = vadd.f32 %v3322_v3, %v3288_v30  ;;  %v3365_v43 = vmul.f32 %v3288_v30, %v3000_v38  ;;  %v2396_v51 = vadd.f32 %v2327_v6, %v2035_v18  ;;  %v1968_v17 = vpop.f32.mrf.mxu1  ;;  %v2169_v38 = vunpack.c.l.b16 %v2093_v63  ;;  %s3457_s8 = sshll.u32 %s3454_s17, 4  ;;  %s3458_s8 = int_to_ptr.hbm [resolvable:$true] %s3457_s8 }
 0x28b   : > { %v2036_v37 = vadd.f32 %v1968_v17, %v4930_v44  ;;  %v2828_v44 = vsel %vm2793_vm7, %v2825_v47, %v2827_v36  ;;  %v3178_v17 = vpop.permute.xlu1 %3177  ;;  %s4199_s10 = sshra.s32 %s3458_s8, 4  ;;  %s4200_s10 = int_to_ptr.hbm [resolvable:$true] %s4199_s10 }
 0x28c   : > { %v3400_v35 = vadd.f32 %v3399_v62, %v3365_v43  ;;  %v2765_v55 = vadd.f32 %v5540_v48, %v2396_v51  ;;  %v2934_v1 = vpop.f32.mrf.mxu0  ;;  %v2188_v6 = vpack.c.b16 %v2169_v38, %v2169_v38  ;;  %s4201_s11 = scalar_lea.hbm %s4200_s10, 288  ;;  %p4206_p1 = scmp.lt.s32.totalorder %s4200_s10, %s5750_s3 }
 0x28d   : > { %p4202_p12 = scmp.ne.s32.totalorder %s4200_s10, %s4201_s11  ;;  %p4207_p2 = scmp.lt.s32.totalorder %s4205_s29, %s4201_s11 }
 0x28e   : > { %v3001_v32 = vadd.f32 %v2932_v11, %v2765_v55  ;;  %v5605_v7 = vpop.f32.mrf.mxu3  ;;  %v2224_v55 = vrot.slane %v2188_v6, 2 }
 0x28f   : > { %p4203_p13 = pnand %p4202_p12, %p4400_p4  ;;  %p4208_p3 = por %p4207_p2, %p4206_p1 }
 0x290   : > { %3037 = vst [vmem:[%s5270_s7 + $0x70] sm:$0xff] %v3001_v32  ;;  %v3289_v3 = vmul.f32 %v3168_v54, %v3001_v32  ;;  %v2829_v54 = vrot.slane %v5567_v21, 3 }
 0x291   : > { %v2329_v49 = vpop.f32.mrf.mxu2  ;;  %p4204_p0 = pneg %p4203_p13 }
 0x292   : > { %v3324_v48 = vadd.f32 %v3323_v41, %v3289_v3  ;;  %v3366_v0 = vmul.f32 %v3289_v3, %v3001_v32  ;;  %v2397_v26 = vadd.f32 %v2329_v49, %v2036_v37  ;;  %v1971_v59 = vpop.f32.mrf.mxu1 }
 0x293   : > { %v2037_v13 = vadd.f32 %v1971_v59, %v4944_v9  ;;  %p4209_p5 = pnand %p4208_p3, %p4204_p0 }
 0x294   : > { %v3401_v62 = vadd.f32 %v3400_v35, %v3366_v0  ;;  %v2766_v50 = vadd.f32 %v5564_v15, %v2397_v26  ;;  %v2937_v11 = vpop.f32.mrf.mxu0  ;;  %v1863_v35 = vrot.slane %v4925_v12, 2  ;;  %v2225_v0 = vsel %vm1827_vm6, %v2222_v16, %v2224_v55 }
 0x295   : > { %3896 = vmatmul.msk.bf16.gmra.mxu1 %vm559_vm2, %v1862_v34  ;;  %v3183_v34 = vpop.permute.xlu2 %3182 }
 0x296   : > { %v3002_v10 = vadd.f32 %v2934_v1, %v2766_v50  ;;  %3983 = vmatmul.msk.bf16.gmra.mxu2 %vm559_vm2, %v2223_v2  ;;  %v2708_v15 = vpop.f32.mrf.mxu3 }
 0x297   : > { %4021 = vmatmul.msk.bf16.gmra.mxu0 %vm559_vm2, %v2828_v44 }
 0x298   : > { %3038 = vst [vmem:[%s5270_s7 + $0x78] sm:$0xff] %v3002_v10  ;;  %v3290_v60 = vmul.f32 %v3173_v27, %v3002_v10 }
 0x299   : > { %v2332_v53 = vpop.f32.mrf.mxu2 }
 0x29a   : > { %v3325_v19 = vadd.f32 %v3324_v48, %v3290_v60  ;;  %v3367_v18 = vmul.f32 %v3290_v60, %v3002_v10  ;;  %v2398_v47 = vadd.f32 %v2332_v53, %v2037_v13  ;;  %v1973_v30 = vpop.f32.mrf.mxu1  ;;  %v3188_v10 = vpop.permute.xlu0 %3187 }
 0x29b   : > { %v2038_v9 = vadd.f32 %v1973_v30, %v4960_v46  ;;  %v2830_v46 = vsel %vm2793_vm7, %v2827_v36, %v2829_v54 }
 0x29c   : > { %v3402_v41 = vadd.f32 %v3401_v62, %v3367_v18  ;;  %v2767_v43 = vadd.f32 %v5578_v52, %v2398_v47  ;;  %v2939_v51 = vpop.f32.mrf.mxu0  ;;  %v1864_v52 = vsel %vm1827_vm6, %v1861_v31, %v1863_v35 }
 0x29e   : > { %v3003_v8 = vadd.f32 %v2937_v11, %v2767_v43  ;;  %v2711_v58 = vpop.f32.mrf.mxu3 }
 0x2a0   : > { %3039 = vst [vmem:[%s5270_s7 + $0x80] sm:$0xff] %v3003_v8  ;;  %v3291_v1 = vmul.f32 %v3178_v17, %v3003_v8 }
 0x2a1   : > { %v2334_v32 = vpop.f32.mrf.mxu2 }
 0x2a2   : > { %v3326_v37 = vadd.f32 %v3325_v19, %v3291_v1  ;;  %v3368_v3 = vmul.f32 %v3291_v1, %v3003_v8  ;;  %v2399_v49 = vadd.f32 %v2334_v32, %v2038_v9  ;;  %v1976_v48 = vpop.f32.mrf.mxu1 }
 0x2a3   : > { %v2039_v21 = vadd.f32 %v1976_v48, %v4980_v14 }
 0x2a4   : > { %v3403_v26 = vadd.f32 %v3402_v41, %v3368_v3  ;;  %v2768_v12 = vadd.f32 %v5595_v20, %v2399_v49  ;;  %v2942_v59 = vpop.f32.mrf.mxu0 }
 0x2a5   : > { %3897 = vmatmul.msk.bf16.gmra.mxu1 %vm559_vm2, %v1864_v52 }
 0x2a6   : > { %v3004_v2 = vadd.f32 %v2939_v51, %v2768_v12  ;;  %3984 = vmatmul.msk.bf16.gmra.mxu2 %vm559_vm2, %v2225_v0  ;;  %v2713_v62 = vpop.f32.mrf.mxu3 }
 0x2a7   : > { %4022 = vmatmul.msk.bf16.gmra.mxu0 %vm559_vm2, %v2830_v46 }
 0x2a8   : > { %3040 = vst [vmem:[%s5270_s7 + $0x88] sm:$0xff] %v3004_v2  ;;  %v3292_v31 = vmul.f32 %v3183_v34, %v3004_v2 }
 0x2a9   : > { %v2337_v16 = vpop.f32.mrf.mxu2 }
 0x2aa   : > { %v3327_v50 = vadd.f32 %v3326_v37, %v3292_v31  ;;  %v3369_v20 = vmul.f32 %v3292_v31, %v3004_v2  ;;  %v2400_v11 = vadd.f32 %v2337_v16, %v2039_v21  ;;  %v1978_v44 = vpop.f32.mrf.mxu1 }
 0x2ab   : > { %v2040_v13 = vadd.f32 %v1978_v44, %v4997_v57 }
 0x2ac   : > { %v3404_v36 = vadd.f32 %v3403_v26, %v3369_v20  ;;  %v2769_v63 = vadd.f32 %v5605_v7, %v2400_v11  ;;  %v2944_v27 = vpop.f32.mrf.mxu0  ;;  %v3193_v7 = vpop.permute.xlu1 %3192 }
 0x2ae   : > { %v3005_v38 = vadd.f32 %v2942_v59, %v2769_v63  ;;  %v2716_v14 = vpop.f32.mrf.mxu3 }
 0x2b0   : > { %3041 = vst [vmem:[%s5270_s7 + $0x90] sm:$0xff] %v3005_v38  ;;  %v3293_v60 = vmul.f32 %v3188_v10, %v3005_v38 }
 0x2b1   : > { %v2339_v53 = vpop.f32.mrf.mxu2 }
 0x2b2   : > { %v3328_v19 = vadd.f32 %v3327_v50, %v3293_v60  ;;  %v3370_v18 = vmul.f32 %v3293_v60, %v3005_v38  ;;  %v2401_v47 = vadd.f32 %v2339_v53, %v2040_v13  ;;  %v1981_v30 = vpop.f32.mrf.mxu1 }
 0x2b3   : > { %v2041_v17 = vadd.f32 %v1981_v30, %v5010_v29 }
 0x2b4   : > { %v3405_v6 = vadd.f32 %v3404_v36, %v3370_v18  ;;  %v2770_v41 = vadd.f32 %v2708_v15, %v2401_v47  ;;  %v2947_v43 = vpop.f32.mrf.mxu0  ;;  %v3198_v15 = vpop.permute.xlu2 %3197 }
 0x2b6   : > { %v3006_v51 = vadd.f32 %v2944_v27, %v2770_v41  ;;  %v2718_v54 = vpop.f32.mrf.mxu3 }
 0x2b8   : > { %3042 = vst [vmem:[%s5270_s7 + $0x98] sm:$0xff] %v3006_v51  ;;  %v3294_v8 = vmul.f32 %v3193_v7, %v3006_v51 }
 0x2b9   : > { %v2342_v35 = vpop.f32.mrf.mxu2 }
 0x2ba   : > { %v3329_v55 = vadd.f32 %v3328_v19, %v3294_v8  ;;  %v3371_v57 = vmul.f32 %v3294_v8, %v3006_v51  ;;  %v2402_v9 = vadd.f32 %v2342_v35, %v2041_v17  ;;  %v1983_v1 = vpop.f32.mrf.mxu1 }
 0x2bb   : > { %v2042_v52 = vadd.f32 %v1983_v1, %v5027_v24 }
 0x2bc   : > { %v3406_v32 = vadd.f32 %v3405_v6, %v3371_v57  ;;  %v2771_v37 = vadd.f32 %v2711_v58, %v2402_v9  ;;  %v2949_v3 = vpop.f32.mrf.mxu0  ;;  %v3203_v58 = vpop.permute.xlu0 %3202 }
 0x2be   : > { %v3007_v49 = vadd.f32 %v2947_v43, %v2771_v37  ;;  %v2721_v21 = vpop.f32.mrf.mxu3 }
 0x2c0   : > { %3043 = vst [vmem:[%s5270_s7 + $0xa0] sm:$0xff] %v3007_v49  ;;  %v3295_v48 = vmul.f32 %v3198_v15, %v3007_v49 }
 0x2c1   : > { %v2344_v0 = vpop.f32.mrf.mxu2 }
 0x2c2   : > { %v3330_v26 = vadd.f32 %v3329_v55, %v3295_v48  ;;  %v3372_v29 = vmul.f32 %v3295_v48, %v3007_v49  ;;  %v2403_v12 = vadd.f32 %v2344_v0, %v2042_v52  ;;  %v1986_v59 = vpop.f32.mrf.mxu1 }
 0x2c3   : > { %v2043_v50 = vadd.f32 %v1986_v59, %v5036_v61 }
 0x2c4   : > { %v3407_v46 = vadd.f32 %v3406_v32, %v3372_v29  ;;  %v2772_v34 = vadd.f32 %v2713_v62, %v2403_v12  ;;  %v2952_v2 = vpop.f32.mrf.mxu0  ;;  %v3208_v62 = vpop.permute.xlu1 %3207 }
 0x2c6   : > { %v3008_v31 = vadd.f32 %v2949_v3, %v2772_v34  ;;  %v2723_v13 = vpop.f32.mrf.mxu3 }
 0x2c8   : > { %3044 = vst [vmem:[%s5270_s7 + $0xa8] sm:$0xff] %v3008_v31  ;;  %v3296_v16 = vmul.f32 %v3203_v58, %v3008_v31 }
 0x2c9   : > { %v2347_v20 = vpop.f32.mrf.mxu2 }
 0x2ca   : > { %v3331_v11 = vadd.f32 %v3330_v26, %v3296_v16  ;;  %v3373_v44 = vmul.f32 %v3296_v16, %v3008_v31  ;;  %v2404_v24 = vadd.f32 %v2347_v20, %v2043_v50  ;;  %v1988_v36 = vpop.f32.mrf.mxu1 }
 0x2cb   : > { %v2044_v53 = vadd.f32 %v1988_v36, %v5049_v25 }
 0x2cc   : > { %v3408_v63 = vadd.f32 %v3407_v46, %v3373_v44  ;;  %v2773_v27 = vadd.f32 %v2716_v14, %v2404_v24  ;;  %v2954_v10 = vpop.f32.mrf.mxu0  ;;  %v3213_v14 = vpop.permute.xlu2 %3212 }
 0x2ce   : > { %v3009_v38 = vadd.f32 %v2952_v2, %v2773_v27  ;;  %v2726_v35 = vpop.f32.mrf.mxu3  ;;  %v3223_v2 = vpop.permute.xlu1 %3222 }
 0x2d0   : > { %3045 = vst [vmem:[%s5270_s7 + $0xb0] sm:$0xff] %v3009_v38  ;;  %v3297_v60 = vmul.f32 %v3208_v62, %v3009_v38 }
 0x2d1   : > { %v2349_v19 = vpop.f32.mrf.mxu2 }
 0x2d2   : > { %v3332_v18 = vadd.f32 %v3331_v11, %v3297_v60  ;;  %v3374_v47 = vmul.f32 %v3297_v60, %v3009_v38  ;;  %v2405_v61 = vadd.f32 %v2349_v19, %v2044_v53  ;;  %v1991_v30 = vpop.f32.mrf.mxu1 }
 0x2d3   : > { %v2045_v17 = vadd.f32 %v1991_v30, %v5063_v56 }
 0x2d4   : > { %v3409_v6 = vadd.f32 %v3408_v63, %v3374_v47  ;;  %v2774_v41 = vadd.f32 %v2718_v54, %v2405_v61  ;;  %v2957_v43 = vpop.f32.mrf.mxu0  ;;  %v3218_v54 = vpop.permute.xlu0 %3217 }
 0x2d5   : > { %v3228_v27 = vpop.permute.xlu2 %3227 }
 0x2d6   : > { %v3010_v51 = vadd.f32 %v2954_v10, %v2774_v41  ;;  %v2728_v29 = vpop.f32.mrf.mxu3 }
 0x2d8   : > { %3046 = vst [vmem:[%s5270_s7 + $0xb8] sm:$0xff] %v3010_v51  ;;  %v3298_v7 = vmul.f32 %v3213_v14, %v3010_v51 }
 0x2d9   : > { %v2352_v8 = vpop.f32.mrf.mxu2 }
 0x2da   : > { %v3333_v55 = vadd.f32 %v3332_v18, %v3298_v7  ;;  %v3375_v57 = vmul.f32 %v3298_v7, %v3010_v51  ;;  %v2406_v25 = vadd.f32 %v2352_v8, %v2045_v17  ;;  %v1993_v9 = vpop.f32.mrf.mxu1 }
 0x2db   : > { %v2046_v15 = vadd.f32 %v1993_v9, %v5084_v23 }
 0x2dc   : > { %v3410_v1 = vadd.f32 %v3409_v6, %v3375_v57  ;;  %v2775_v32 = vadd.f32 %v2721_v21, %v2406_v25  ;;  %v2959_v37 = vpop.f32.mrf.mxu0  ;;  %v3233_v30 = vpop.permute.xlu0 %3232 }
 0x2dd   : > { %v3238_v25 = vpop.permute.xlu1 %3237 }
 0x2de   : > { %v3011_v3 = vadd.f32 %v2957_v43, %v2775_v32  ;;  %v2731_v36 = vpop.f32.mrf.mxu3 }
 0x2e0   : > { %3047 = vst [vmem:[%s5270_s7 + $0xc0] sm:$0xff] %v3011_v3  ;;  %v3299_v49 = vmul.f32 %v3218_v54, %v3011_v3 }
 0x2e1   : > { %v2354_v48 = vpop.f32.mrf.mxu2 }
 0x2e2   : > { %v3334_v52 = vadd.f32 %v3333_v55, %v3299_v49  ;;  %v3376_v0 = vmul.f32 %v3299_v49, %v3011_v3  ;;  %v2407_v56 = vadd.f32 %v2354_v48, %v2046_v15  ;;  %v1996_v26 = vpop.f32.mrf.mxu1 }
 0x2e3   : > { %v2047_v31 = vadd.f32 %v1996_v26, %v5098_v28 }
 0x2e4   : > { %v3411_v12 = vadd.f32 %v3410_v1, %v3376_v0  ;;  %v2776_v59 = vadd.f32 %v2723_v13, %v2407_v56  ;;  %v2962_v46 = vpop.f32.mrf.mxu0  ;;  %v3243_v56 = vpop.permute.xlu2 %3242 }
 0x2e6   : > { %v3012_v34 = vadd.f32 %v2959_v37, %v2776_v59  ;;  %v2733_v6 = vpop.f32.mrf.mxu3 }
 0x2e8   : > { %3048 = vst [vmem:[%s5270_s7 + $0xc8] sm:$0xff] %v3012_v34  ;;  %v3300_v21 = vmul.f32 %v3223_v2, %v3012_v34 }
 0x2e9   : > { %v2357_v58 = vpop.f32.mrf.mxu2 }
 0x2ea   : > { %v3335_v16 = vadd.f32 %v3334_v52, %v3300_v21  ;;  %v3377_v50 = vmul.f32 %v3300_v21, %v3012_v34  ;;  %v2408_v23 = vadd.f32 %v2357_v58, %v2047_v31  ;;  %v1998_v20 = vpop.f32.mrf.mxu1 }
 0x2eb   : > { %v2048_v38 = vadd.f32 %v1998_v20, %v5115_v4 }
 0x2ec   : > { %v3412_v11 = vadd.f32 %v3411_v12, %v3377_v50  ;;  %v2777_v44 = vadd.f32 %v2726_v35, %v2408_v23  ;;  %v2964_v24 = vpop.f32.mrf.mxu0  ;;  %v3248_v50 = vpop.permute.xlu0 %3247 }
 0x2ee   : > { %v3013_v63 = vadd.f32 %v2962_v46, %v2777_v44  ;;  %v2736_v37 = vpop.f32.mrf.mxu3 }
 0x2f0   : > { %3049 = vst [vmem:[%s5270_s7 + $0xd0] sm:$0xff] %v3013_v63  ;;  %v3301_v10 = vmul.f32 %v3228_v27, %v3013_v63 }
 0x2f1   : > { %v2359_v62 = vpop.f32.mrf.mxu2 }
 0x2f2   : > { %v3336_v13 = vadd.f32 %v3335_v16, %v3301_v10  ;;  %v3378_v60 = vmul.f32 %v3301_v10, %v3013_v63  ;;  %v2409_v28 = vadd.f32 %v2359_v62, %v2048_v38  ;;  %v2001_v53 = vpop.f32.mrf.mxu1  ;;  %v3253_v62 = vpop.permute.xlu1 %3252 }
 0x2f3   : > { %v2049_v43 = vadd.f32 %v2001_v53, %v5130_v45 }
 0x2f4   : > { %v3413_v19 = vadd.f32 %v3412_v11, %v3378_v60  ;;  %v2778_v18 = vadd.f32 %v2728_v29, %v2409_v28  ;;  %v2967_v47 = vpop.f32.mrf.mxu0 }
 0x2f6   : > { %v3014_v61 = vadd.f32 %v2964_v24, %v2778_v18  ;;  %v2738_v2 = vpop.f32.mrf.mxu3 }
 0x2f8   : > { %3050 = vst [vmem:[%s5270_s7 + $0xd8] sm:$0xff] %v3014_v61  ;;  %v3302_v41 = vmul.f32 %v3233_v30, %v3014_v61 }
 0x2f9   : > { %v2362_v51 = vpop.f32.mrf.mxu2 }
 0x2fa   : > { %v3337_v14 = vadd.f32 %v3336_v13, %v3302_v41  ;;  %v3379_v7 = vmul.f32 %v3302_v41, %v3014_v61  ;;  %v2410_v4 = vadd.f32 %v2362_v51, %v2049_v43  ;;  %v2003_v17 = vpop.f32.mrf.mxu1  ;;  %v3258_v41 = vpop.permute.xlu2 %3257 }
 0x2fb   : > { %v2050_v1 = vadd.f32 %v2003_v17, %v5147_v39 }
 0x2fc   : > { %v3414_v8 = vadd.f32 %v3413_v19, %v3379_v7  ;;  %v2779_v35 = vadd.f32 %v2731_v36, %v2410_v4  ;;  %v2969_v55 = vpop.f32.mrf.mxu0 }
 0x2fe   : > { %v3015_v57 = vadd.f32 %v2967_v47, %v2779_v35  ;;  %v2741_v10 = vpop.f32.mrf.mxu3 }
 0x300   : > { %3051 = vst [vmem:[%s5270_s7 + $0xe0] sm:$0xff] %v3015_v57  ;;  %v3303_v9 = vmul.f32 %v3238_v25, %v3015_v57 }
 0x301   : > { %v2364_v32 = vpop.f32.mrf.mxu2 }
 0x302   : > { %v3338_v3 = vadd.f32 %v3337_v14, %v3303_v9  ;;  %v3380_v54 = vmul.f32 %v3303_v9, %v3015_v57  ;;  %v2411_v45 = vadd.f32 %v2364_v32, %v2050_v1  ;;  %v2006_v49 = vpop.f32.mrf.mxu1  ;;  %v3263_v9 = vpop.permute.xlu0 %3262 }
 0x303   : > { %v2051_v29 = vadd.f32 %v2006_v49, %v5161_v42 }
 0x304   : > { %v3415_v15 = vadd.f32 %v3414_v8, %v3380_v54  ;;  %v2780_v48 = vadd.f32 %v2733_v6, %v2411_v45  ;;  %v2972_v52 = vpop.f32.mrf.mxu0 }
 0x306   : > { %v3016_v0 = vadd.f32 %v2969_v55, %v2780_v48  ;;  %v2743_v43 = vpop.f32.mrf.mxu3 }
 0x308   : > { %3052 = vst [vmem:[%s5270_s7 + $0xe8] sm:$0xff] %v3016_v0  ;;  %v3304_v26 = vmul.f32 %v3243_v56, %v3016_v0  ;;  %v3268_v56 = vpop.permute.xlu1 %3267 }
 0x309   : > { %v2367_v12 = vpop.f32.mrf.mxu2 }
 0x30a   : > { %v3339_v59 = vadd.f32 %v3338_v3, %v3304_v26  ;;  %v3381_v46 = vmul.f32 %v3304_v26, %v3016_v0  ;;  %v2412_v39 = vadd.f32 %v2367_v12, %v2051_v29  ;;  %v2008_v34 = vpop.f32.mrf.mxu1 }
 0x30b   : > { %v2052_v20 = vadd.f32 %v2008_v34, %v5178_v5 }
 0x30c   : > { %v3416_v21 = vadd.f32 %v3415_v15, %v3381_v46  ;;  %v2781_v31 = vadd.f32 %v2736_v37, %v2412_v39  ;;  %v2974_v58 = vpop.f32.mrf.mxu0 }
 0x30e   : > { %v3017_v16 = vadd.f32 %v2972_v52, %v2781_v31  ;;  %v2746_v37 = vpop.f32.mrf.mxu3 }
 0x310   : > { %3053 = vst [vmem:[%s5270_s7 + $0xf0] sm:$0xff] %v3017_v16  ;;  %v3305_v23 = vmul.f32 %v3248_v50, %v3017_v16 }
 0x311   : > { %v2369_v11 = vpop.f32.mrf.mxu2 }
 0x312   : > { %v3340_v44 = vadd.f32 %v3339_v59, %v3305_v23  ;;  %v3382_v24 = vmul.f32 %v3305_v23, %v3017_v16  ;;  %v2413_v42 = vadd.f32 %v2369_v11, %v2052_v20  ;;  %v2011_v36 = vpop.f32.mrf.mxu1  ;;  %v3273_v16 = vpop.permute.xlu2 %3272 }
 0x313   : > { %v2053_v28 = vadd.f32 %v2011_v36, %v5192_v22 }
 0x314   : > { %v3417_v63 = vadd.f32 %v3416_v21, %v3382_v24  ;;  %v2782_v27 = vadd.f32 %v2738_v2, %v2413_v42  ;;  %v2977_v13 = vpop.f32.mrf.mxu0 }
 0x316   : > { %v3018_v38 = vadd.f32 %v2974_v58, %v2782_v27  ;;  %v2748_v34 = vpop.f32.mrf.mxu3 }
 0x318   : > { %3054 = vst [vmem:[%s5270_s7 + $0xf8] sm:$0xff] %v3018_v38  ;;  %v3306_v60 = vmul.f32 %v3253_v62, %v3018_v38 }
 0x319   : > { %v2372_v53 = vpop.f32.mrf.mxu2 }
 0x31a   : > { %v3341_v19 = vadd.f32 %v3340_v44, %v3306_v60  ;;  %v3383_v18 = vmul.f32 %v3306_v60, %v3018_v38  ;;  %v2414_v5 = vadd.f32 %v2372_v53, %v2053_v28  ;;  %v2013_v47 = vpop.f32.mrf.mxu1 }
 0x31b   : > { %v2054_v14 = vadd.f32 %v2013_v47, %v5211_v33 }
 0x31c   : > { %v3418_v61 = vadd.f32 %v3417_v63, %v3383_v18  ;;  %v2783_v30 = vadd.f32 %v2741_v10, %v2414_v5  ;;  %v2979_v7 = vpop.f32.mrf.mxu0 }
 0x31e   : > { %v3019_v6 = vadd.f32 %v2977_v13, %v2783_v30 }
 0x320   : > { %3055 = vst [vmem:[%s5270_s7 + $0x100] sm:$0xff] %v3019_v6  ;;  %v3307_v51 = vmul.f32 %v3258_v41, %v3019_v6 }
 0x321   : > { %v2374_v4 = vpop.f32.mrf.mxu2 }
 0x322   : > { %v3342_v17 = vadd.f32 %v3341_v19, %v3307_v51  ;;  %v3384_v8 = vmul.f32 %v3307_v51, %v3019_v6  ;;  %v2415_v22 = vadd.f32 %v2374_v4, %v2054_v14  ;;  %v2016_v35 = vpop.f32.mrf.mxu1 }
 0x323   : > { %v2055_v32 = vadd.f32 %v2016_v35, %v5225_v40  ;;  %v5782_v40 = vld [vmem:[#allocation15_spill] sm:$0xff] }
 0x324   : > { %v3419_v55 = vadd.f32 %v3418_v61, %v3384_v8  ;;  %v2784_v57 = vadd.f32 %v2743_v43, %v2415_v22  ;;  %v2982_v49 = vpop.f32.mrf.mxu0 }
 0x326   : > { %v3020_v25 = vadd.f32 %v2979_v7, %v2784_v57 }
 0x328   : > { %3056 = vst [vmem:[%s5270_s7 + $0x108] sm:$0xff] %v3020_v25  ;;  %v3308_v1 = vmul.f32 %v3263_v9, %v3020_v25 }
 0x329   : > { %v2377_v3 = vpop.f32.mrf.mxu2 }
 0x32a   : > { %v3343_v54 = vadd.f32 %v3342_v17, %v3308_v1  ;;  %v3385_v33 = vmul.f32 %v3308_v1, %v3020_v25  ;;  %v2416_v45 = vadd.f32 %v2377_v3, %v2055_v32  ;;  %v2018_v52 = vpop.f32.mrf.mxu1 }
 0x32b   : > { %v2056_v29 = vadd.f32 %v2018_v52, %v5782_v40 }
 0x32c   : > { %v3420_v15 = vadd.f32 %v3419_v55, %v3385_v33  ;;  %v2785_v48 = vadd.f32 %v2746_v37, %v2416_v45  ;;  %v2984_v31 = vpop.f32.mrf.mxu0 }
 0x32e   : > { %v3021_v0 = vadd.f32 %v2982_v49, %v2785_v48 }
 0x330   : > { %3057 = vst [vmem:[%s5270_s7 + $0x110] sm:$0xff] %v3021_v0  ;;  %v3309_v26 = vmul.f32 %v3268_v56, %v3021_v0 }
 0x331   : > { %v2379_v12 = vpop.f32.mrf.mxu2 }
 0x332   : > { %v3344_v59 = vadd.f32 %v3343_v54, %v3309_v26  ;;  %v3386_v46 = vmul.f32 %v3309_v26, %v3021_v0  ;;  %v2417_v39 = vadd.f32 %v2379_v12, %v2056_v29 }
 0x334   : > { %v3421_v2 = vadd.f32 %v3420_v15, %v3386_v46  ;;  %v2786_v21 = vadd.f32 %v2748_v34, %v2417_v39 }
 0x336   : > { %v3022_v58 = vadd.f32 %v2984_v31, %v2786_v21 }
 0x338   : > { %3058 = vst [vmem:[%s5270_s7 + $0x118] sm:$0xff] %v3022_v58  ;;  %v3310_v50 = vmul.f32 %v3273_v16, %v3022_v58 }
 0x339   : > { %4212 = shalt.err (!%p4209_p5)
}
 0x33a   : > { %s4326_s7 = smov 128   ;;  %s4327_s17 = smov 8   ;;  %v3345_v23 = vadd.f32 %v3344_v59, %v3310_v50  ;;  %v3387_v20 = vmul.f32 %v3310_v50, %v3022_v58 }
 0x33b   : > { %4094 = dma.vmem_to_hbm [thread:$0]  (%p4400_p4), %s3456_s27, 4608, %s3458_s8, %s3432_s9, %s4326_s7, %s4326_s7, %s4327_s17  }
 0x33c   : > { %v3422_v11 = vadd.f32 %v3421_v2, %v3387_v20  ;;  %v3346_v44 = vrot.slane %v3345_v23, 4  ;;  %s3646_s12 = sshll.u32 %s5245_s15, 3  ;;  %s4026_s13 = sshll.u32 %s4315_s21, 3 }
 0x33d   : > { %s3471_s29 = scalar_lea.hbm %s5751_s4, %s4026_s13  ;;  %s5690_s14 = sand.u32 1, %s3640_s24  }
 0x33e   : > { %v3423_v24 = vrot.slane %v3422_v11, 4  ;;  %v3347_v42 = vadd.f32 %v3346_v44, %v3345_v23  ;;  %s3486_s8 = scalar_lea.hbm %s5752_s5, %s4026_s13  ;;  %s259_s9 = scalar_lea.vmem [#allocation4], %s3646_s12 }
 0x33f   : > { %s3473_s21 = sshll.u32 %s259_s9, 4  ;;  %s3475_s15 = sshll.u32 %s3471_s29, 4  ;;  %s3474_s21 = int_to_ptr.vmem [resolvable:$true] %s3473_s21  ;;  %s3476_s15 = int_to_ptr.hbm [resolvable:$true] %s3475_s15 }
 0x340   : > { %v3348_v36 = vrot.slane %v3347_v42, 2  ;;  %v3424_v63 = vadd.f32 %v3423_v24, %v3422_v11  ;;  %s266_s7 = scalar_lea.vmem [#allocation6], %s3646_s12  ;;  %s3490_s10 = sshll.u32 %s3486_s8, 4  ;;  %s5697_s10 = int_to_ptr.hbm [resolvable:$true] %s3490_s10 }
 0x341   : > { %s3488_s17 = sshll.u32 %s266_s7, 4  ;;  %s3437_s24 = scalar_lea.sflag [#allocation5], %s5690_s14  ;;  %s5695_s17 = int_to_ptr.vmem [resolvable:$true] %s3488_s17 }
 0x342   : > { %v3349_v27 = vadd.f32 %v3348_v36, %v3347_v42  ;;  %v3425_v10 = vrot.slane %v3424_v63, 2  ;;  %s4227_s13 = sshra.s32 %s3476_s15, 4  ;;  %s4233_s16 = scalar_lea.hbm %s5751_s4, 16  ;;  %s4228_s13 = int_to_ptr.hbm [resolvable:$true] %s4227_s13 }
 0x343   : > { %s4229_s11 = scalar_lea.hbm %s4228_s13, 8  ;;  %p4234_p10 = scmp.lt.s32.totalorder %s4228_s13, %s5751_s4 }
 0x344   : > { %v3350_v38 = vrot.slane %v3349_v27, 1  ;;  %v3426_v62 = vadd.f32 %v3425_v10, %v3424_v63  ;;  %p4230_p6 = scmp.ne.s32.totalorder %s4228_s13, %s4229_s11  ;;  %p4235_p11 = scmp.lt.s32.totalorder %s4233_s16, %s4229_s11 }
 0x346   : > { %v3351_v13 = vadd.f32 %v3350_v38, %v3349_v27  ;;  %v3427_v60 = vrot.slane %v3426_v62, 1  ;;  %p4231_p7 = pnand %p4230_p6, %p4400_p4  ;;  %p4236_p12 = por %p4235_p11, %p4234_p10 }
 0x348   : > { %3429 = vst [vmem:[%s259_s9] sm:$0xff] %v3351_v13  ;;  %v3428_v28 = vadd.f32 %v3427_v60, %v3426_v62  ;;  %p4232_p9 = pneg %p4231_p7 }
 0x34a   : > { %p4237_p13 = pnand %p4236_p12, %p4232_p9 }
 0x34c   : > { %4240 = shalt.err (!%p4237_p13)
}
 0x34d   : > { %4095 = dma.vmem_to_hbm [thread:$0]  (%p4400_p4), %s3474_s21, 128, %s3476_s15, %s3437_s24   ;;  %3430 = vst [vmem:[%s266_s7] sm:$0xff] %v3428_v28 }
 0x34e   : > { %s4255_s14 = sshra.s32 %s5697_s10, 4  ;;  %s4261_s13 = scalar_lea.hbm %s5752_s5, 16  ;;  %s4256_s14 = int_to_ptr.hbm [resolvable:$true] %s4255_s14 }
 0x34f   : > { %s4257_s9 = scalar_lea.hbm %s4256_s14, 8  ;;  %p4262_p3 = scmp.lt.s32.totalorder %s4256_s14, %s5752_s5 }
 0x350   : > { %p4258_p0 = scmp.ne.s32.totalorder %s4256_s14, %s4257_s9  ;;  %p4263_p5 = scmp.lt.s32.totalorder %s4261_s13, %s4257_s9 }
 0x352   : > { %p4259_p1 = pnand %p4258_p0, %p4400_p4  ;;  %p4264_p6 = por %p4263_p5, %p4262_p3 }
 0x354   : > { %p4260_p2 = pneg %p4259_p1 }
 0x356   : > { %p4265_p7 = pnand %p4264_p6, %p4260_p2 }
 0x358   : > { %4268 = shalt.err (!%p4265_p7)
}
 0x359   : > { %4096 = dma.vmem_to_hbm [thread:$0]  (%p4400_p4), %s5695_s17, 128, %s5697_s10, %s3437_s24  }
 0x35a PF: > { %p4110_p9 = scmp.ge.s32.totalorder %s4323_s23, 2  ;;  %s3502_s21 = sand.u32 1, %s4303_s18  }
 0x35b   : > { %s3503_s15 = scalar_lea.sflag [#allocation3], %s3502_s21 }
 0x35c   : > { %p4101_p10 = pnand %p4110_p9, %p4409_p8 }
 0x35e   : > { %p4102_p11 = pneg %p4101_p10 }
 0x360   : > { %4294 = dma.done.wait (%p4102_p11), %s3503_s15, 4608  }
 0x361   : > { %4296 = vsyncadd (%p4102_p11), %s3503_s15, 4294962688  ;;  %s3512_s7 = sand.u32 1, %s3641_s25  }
 0x362   : > { %s3513_s27 = scalar_lea.sflag [#allocation5], %s3512_s7 }
 0x363   : > { %4298 = dma.done.wait (%p4102_p11), %s3513_s27, 256  }
 0x364   : > { %4300 = vsyncadd (%p4102_p11), %s3513_s27, 4294967040  ;;  %s22_s23 = sadd.s32 1, %s4323_s23   ;;  %s5783_s18 = smov %s4307_s19 }
 0x365   : > { %p19_p4 = scmp.ge.s32.totalorder %s22_s23, 4   ;;  %s5784_s19 = smov %s4311_s20 }
 0x366   : > { %s5785_s20 = smov %s4415_s6  ;;  %s5786_s21 = smov %s4319_s22 }
 0x367   : > { %s5787_s22 = smov %s5789_s26  ;;  %21 = sbr.rel (!%p19_p4) target bundleno = 6 (0x6), region = 110 }
 0x36c   :  { %3529 = vsyncpa [#allocation3], 1 }
 0x36d   :  { %3531 = vsyncpa [#allocation3 + $0x1], 1 }
 0x36e   :  { %3532 = vsyncpa [#allocation5], 1 }
 0x36f   :  { %3534 = vsyncpa [#allocation5 + $0x1], 1 }

</bundles_post_ra>
